<compile_context>
chip_gen: v6e
topology: v6e:2x2x1
jax: 0.10.0
libtpu: 0.0.40
codegen_flags: <defaults>
</compile_context>

<pallas_src>
import jax
import jax.numpy as jnp
from jax import lax
from jax.experimental import pallas as pl
from jax.experimental.pallas import tpu as pltpu

D_IN = 2048
D_HID = 64
D_OUT = 2
BN_EPS = 1e-5
# nn.LeakyReLU(True): `True` lands in the negative_slope arg -> slope == 1.0,
# i.e. the activation is an exact identity in the forward pass (faithful to PyTorch).
LEAKY_SLOPE = 1.0


def _round_up(n, m):
    return ((n + m - 1) // m) * m


def _discriminator_kernel(x_ref, w1_ref, b1_ref, w2_ref, b2_ref, o_ref):
    # TODO(synk): GradReverse only affects the backward pass (grad negated * constant);
    # forward is identity, so nothing to emit here.
    x = x_ref[...]                                                    # (TB, 2048)

    # Linear(2048, 64) with eval-mode BatchNorm1d(64) pre-folded into w1/b1.
    h = jnp.dot(x, w1_ref[...], preferred_element_type=jnp.float32) + b1_ref[...]

    # LeakyReLU(negative_slope=1.0) is an exact identity -> skipped.
    if LEAKY_SLOPE != 1.0:  # kept for generality; dead code at slope == 1.0
        h = jnp.where(h >= 0, h, LEAKY_SLOPE * h)

    # Dropout() in eval mode: identity.

    # Linear(64, 2)
    logits = jnp.dot(h, w2_ref[...], preferred_element_type=jnp.float32) + b2_ref[...]

    # LogSoftmax(dim=1), 2-class closed form: lse = l0 + softplus(l1 - l0),
    # softplus computed stably. Avoids cross-lane max/sum over a 2-wide register.
    l0 = logits[:, 0:1]
    d = logits[:, 1:2] - l0
    sp = jnp.maximum(d, 0.0) + jnp.log1p(jnp.exp(-jnp.abs(d)))
    o_ref[...] = logits - (l0 + sp)


def _fold_bn_into_linear(params):
    """Eval-mode BN is affine per feature: fold it into the first Linear."""
    scale = params["gamma"] * lax.rsqrt(params["var"] + BN_EPS)         # (1, 64)
    w1 = params["w1"] * scale                                            # (2048, 64)
    b1 = (params["b1"] - params["mean"]) * scale + params["beta"]        # (1, 64)
    return w1, b1


def discriminator_forward(x, params, constant=1.0, block_b=512):
    """x: (B, 2048) float32. `constant` only matters for the (untranslated) backward."""
    del constant  # GradReverse forward is identity
    B = x.shape[0]

    w1, b1 = _fold_bn_into_linear(params)      # one-time constant fold under jit
    w2, b2 = params["w2"], params["b2"]

    # Batch tile: multiple of 8 (sublane), capped at block_b (VMEM budget:
    # TB=512 -> 4 MiB x tile, double-buffered 8 MiB; safe on v5e/v6e/v7x).
    tb = min(block_b, _round_up(B, 8))
    b_padded = _round_up(B, tb)
    if b_padded != B:
        x = jnp.pad(x, ((0, b_padded - B), (0, 0)))

    out = pl.pallas_call(
        _discriminator_kernel,
        out_shape=jax.ShapeDtypeStruct((b_padded, D_OUT), jnp.float32),
        grid_spec=pltpu.PrefetchScalarGridSpec(
            num_scalar_prefetch=0,
            grid=(b_padded // tb,),
            in_specs=[
                pl.BlockSpec((tb, D_IN), lambda i: (i, 0)),      # x: streamed per tile
                pl.BlockSpec((D_IN, D_HID), lambda i: (0, 0)),   # w1: VMEM-resident
                pl.BlockSpec((1, D_HID), lambda i: (0, 0)),      # b1
                pl.BlockSpec((D_HID, D_OUT), lambda i: (0, 0)),  # w2
                pl.BlockSpec((1, D_OUT), lambda i: (0, 0)),      # b2
            ],
            out_specs=pl.BlockSpec((tb, D_OUT), lambda i: (i, 0)),
        ),
        compiler_params=pltpu.CompilerParams(
            dimension_semantics=("parallel",),      # megacore sharding on v7x
            vmem_limit_bytes=32 * 1024 * 1024,      # raise v5e's 16 MiB default
        ),
    )(x, w1, b1, w2, b2)
    return out[:B]


def init_params(key):
    k1, k2, k3, k4, k5, k6 = jax.random.split(key, 6)
    # PyTorch Linear default init: U(-1/sqrt(fan_in), 1/sqrt(fan_in))
    lim1 = 1.0 / (D_IN ** 0.5)
    lim2 = 1.0 / (D_HID ** 0.5)
    return {
        # stored as (in, out) = transpose of PyTorch's (out, in)
        "w1": jax.random.uniform(k1, (D_IN, D_HID), jnp.float32, -lim1, lim1),
        "b1": jax.random.uniform(k2, (1, D_HID), jnp.float32, -lim1, lim1),
        # BatchNorm1d(64): deterministic, non-trivial values
        "gamma": 1.0 + 0.1 * jax.random.normal(k3, (1, D_HID), jnp.float32),
        "beta": 0.1 * jax.random.normal(k4, (1, D_HID), jnp.float32),
        "mean": 0.05 * jax.random.normal(jax.random.fold_in(k3, 1), (1, D_HID), jnp.float32),
        "var": 1.0 + 0.1 * jax.random.uniform(jax.random.fold_in(k4, 1), (1, D_HID), jnp.float32),
        "w2": jax.random.uniform(k5, (D_HID, D_OUT), jnp.float32, -lim2, lim2),
        "b2": jax.random.uniform(k6, (1, D_OUT), jnp.float32, -lim2, lim2),
    }


def _reference_forward(x, p):
    """Pure-JAX reference of the original (un-folded) module chain."""
    h = x @ p["w1"] + p["b1"]
    h = (h - p["mean"]) / jnp.sqrt(p["var"] + BN_EPS) * p["gamma"] + p["beta"]
    h = jnp.where(h >= 0, h, LEAKY_SLOPE * h)
    logits = h @ p["w2"] + p["b2"]
    return jax.nn.log_softmax(logits, axis=1)


if __name__ == "__main__":
    key = jax.random.PRNGKey(0)
    pkey, xkey = jax.random.split(key)
    params = init_params(pkey)

    # B=64: tile == batch; B=70: exercises the pad-to-multiple-of-8 path.
    for B in (64, 70):
        x = jax.random.normal(jax.random.fold_in(xkey, B), (B, D_IN), jnp.float32)
        out = jax.block_until_ready(discriminator_forward(x, params, constant=0.5))
        ref = _reference_forward(x, params)
        assert out.shape == (B, D_OUT)
        assert jnp.allclose(out, ref, atol=1e-4, rtol=1e-4), f"mismatch vs reference at B={B}"
    print("KERNEL_OK")
</pallas_src>

<mosaic_0001>
module attributes {stable_mosaic.version = 11 : i64} {
  func.func @_discriminator_kernel(%arg0: i32, %arg1: memref<64x2048xf32, #tpu.memory_space<vmem>>, %arg2: memref<2048x64xf32, #tpu.memory_space<vmem>>, %arg3: memref<1x64xf32, #tpu.memory_space<vmem>>, %arg4: memref<64x2xf32, #tpu.memory_space<vmem>>, %arg5: memref<1x2xf32, #tpu.memory_space<vmem>>, %arg6: memref<64x2xf32, #tpu.memory_space<vmem>>) attributes {dimension_semantics = [#tpu.dimension_semantics<parallel>], iteration_bounds = array<i64: 1>, scalar_prefetch = 0 : i64, scratch_operands = 0 : i64, tpu.core_type = #tpu.core_type<tc>, window_params = [{transform_indices = @transform_0, window_bounds = array<i64: 64, 2048>}, {pipeline_mode = #tpu.pipeline_mode<synchronous>, transform_indices = @transform_1, window_bounds = array<i64: 2048, 64>}, {pipeline_mode = #tpu.pipeline_mode<synchronous>, transform_indices = @transform_2, window_bounds = array<i64: 1, 64>}, {pipeline_mode = #tpu.pipeline_mode<synchronous>, transform_indices = @transform_3, window_bounds = array<i64: 64, 2>}, {pipeline_mode = #tpu.pipeline_mode<synchronous>, transform_indices = @transform_4, window_bounds = array<i64: 1, 2>}, {transform_indices = @transform_5, window_bounds = array<i64: 64, 2>}]} {
    %c0 = arith.constant 0 : index
    %c0_0 = arith.constant 0 : index
    %0 = vector.load %arg1[%c0, %c0_0] : memref<64x2048xf32, #tpu.memory_space<vmem>>, vector<64x2048xf32>
    %c0_1 = arith.constant 0 : index
    %c0_2 = arith.constant 0 : index
    %1 = vector.load %arg2[%c0_1, %c0_2] : memref<2048x64xf32, #tpu.memory_space<vmem>>, vector<2048x64xf32>
    %cst = arith.constant dense<0.000000e+00> : vector<64x64xf32>
    %2 = tpu.matmul %0, %1, %cst {dimension_numbers = #tpu.dot_dimension_numbers<[1], [0], [0], [1], [0, 0, 1, 1], [], []>} : vector<64x2048xf32>, vector<2048x64xf32>, vector<64x64xf32> -> vector<64x64xf32>
    %c0_3 = arith.constant 0 : index
    %c0_4 = arith.constant 0 : index
    %3 = vector.load %arg3[%c0_3, %c0_4] : memref<1x64xf32, #tpu.memory_space<vmem>>, vector<1x64xf32>
    %4 = vector.broadcast %3 : vector<1x64xf32> to vector<64x64xf32>
    %5 = arith.addf %2, %4 : vector<64x64xf32>
    %c0_5 = arith.constant 0 : index
    %c0_6 = arith.constant 0 : index
    %6 = vector.load %arg4[%c0_5, %c0_6] : memref<64x2xf32, #tpu.memory_space<vmem>>, vector<64x2xf32>
    %cst_7 = arith.constant dense<0.000000e+00> : vector<64x2xf32>
    %7 = tpu.matmul %5, %6, %cst_7 {dimension_numbers = #tpu.dot_dimension_numbers<[1], [0], [0], [1], [0, 0, 1, 1], [], []>} : vector<64x64xf32>, vector<64x2xf32>, vector<64x2xf32> -> vector<64x2xf32>
    %c0_8 = arith.constant 0 : index
    %c0_9 = arith.constant 0 : index
    %8 = vector.load %arg5[%c0_8, %c0_9] : memref<1x2xf32, #tpu.memory_space<vmem>>, vector<1x2xf32>
    %9 = vector.broadcast %8 : vector<1x2xf32> to vector<64x2xf32>
    %10 = arith.addf %7, %9 : vector<64x2xf32>
    %11 = vector.extract_strided_slice %10 {offsets = [0, 0], sizes = [64, 1], strides = [1, 1]} : vector<64x2xf32> to vector<64x1xf32>
    %12 = vector.extract_strided_slice %10 {offsets = [0, 1], sizes = [64, 1], strides = [1, 1]} : vector<64x2xf32> to vector<64x1xf32>
    %13 = arith.subf %12, %11 : vector<64x1xf32>
    %cst_10 = arith.constant 0.000000e+00 : f32
    %14 = vector.broadcast %cst_10 : f32 to vector<64x1xf32>
    %15 = arith.maximumf %13, %14 : vector<64x1xf32>
    %16 = math.absf %13 : vector<64x1xf32>
    %cst_11 = arith.constant 0.000000e+00 : f32
    %17 = vector.broadcast %cst_11 : f32 to vector<64x1xf32>
    %18 = arith.subf %17, %16 : vector<64x1xf32>
    %19 = math.exp %18 : vector<64x1xf32>
    %20 = math.log1p %19 : vector<64x1xf32>
    %21 = arith.addf %15, %20 : vector<64x1xf32>
    %22 = arith.addf %11, %21 : vector<64x1xf32>
    %23 = vector.broadcast %22 : vector<64x1xf32> to vector<64x2xf32>
    %24 = arith.subf %10, %23 : vector<64x2xf32>
    %c0_12 = arith.constant 0 : index
    %c0_13 = arith.constant 0 : index
    %25 = vector.load %arg6[%c0_12, %c0_13] : memref<64x2xf32, #tpu.memory_space<vmem>>, vector<64x2xf32>
    tpu.vector_store %arg6[%c0_12, %c0_13], %24 {strides = array<i32>} : memref<64x2xf32, #tpu.memory_space<vmem>>, vector<64x2xf32>,
    return
  }
  func.func @transform_0(%arg0: i32) -> (i32, i32) {
    %c0_i32 = arith.constant 0 : i32
    %c0_i32_0 = arith.constant 0 : i32
    return %arg0, %c0_i32 : i32, i32
  }
  func.func @transform_1(%arg0: i32) -> (i32, i32) {
    %c0_i32 = arith.constant 0 : i32
    %c0_i32_0 = arith.constant 0 : i32
    %c0_i32_1 = arith.constant 0 : i32
    return %c0_i32, %c0_i32_0 : i32, i32
  }
  func.func @transform_2(%arg0: i32) -> (i32, i32) {
    %c0_i32 = arith.constant 0 : i32
    %c0_i32_0 = arith.constant 0 : i32
    %c0_i32_1 = arith.constant 0 : i32
    return %c0_i32, %c0_i32_0 : i32, i32
  }
  func.func @transform_3(%arg0: i32) -> (i32, i32) {
    %c0_i32 = arith.constant 0 : i32
    %c0_i32_0 = arith.constant 0 : i32
    %c0_i32_1 = arith.constant 0 : i32
    return %c0_i32, %c0_i32_0 : i32, i32
  }
  func.func @transform_4(%arg0: i32) -> (i32, i32) {
    %c0_i32 = arith.constant 0 : i32
    %c0_i32_0 = arith.constant 0 : i32
    %c0_i32_1 = arith.constant 0 : i32
    return %c0_i32, %c0_i32_0 : i32, i32
  }
  func.func @transform_5(%arg0: i32) -> (i32, i32) {
    %c0_i32 = arith.constant 0 : i32
    %c0_i32_0 = arith.constant 0 : i32
    return %arg0, %c0_i32 : i32, i32
  }
}

</mosaic_0001>

<bundles_post_ra>
// kernel: tpu_custom_call.1
= control target key start
LH: loop header
LB: loop body
LE: loop exit
PB: predicated region body
PF: predicated region fallthrough
CT: control target
= control target key end

     0   :  { %vm1266_vm0 = vcmask 523264   ;;  %s2212_s25 = smov 1   ;;  %vm1644_vm9 = vcmask 15360   ;;  %s3730_s1 = inlined_call_operand.vmem [shape: f32[2048,64], index: 1, kind: input, shape index: {}]   ;;  %s3731_s0 = inlined_call_operand.vmem [shape: f32[64,2048], index: 0, kind: input, shape index: {}]   ;;  %s3732_s2 = inlined_call_operand.vmem [shape: f32[1,64], index: 2, kind: input, shape index: {}]   ;;  %s3733_s3 = inlined_call_operand.vmem [shape: f32[64,2], index: 3, kind: input, shape index: {}]   ;;  %s3734_s4 = inlined_call_operand.vmem [shape: f32[1,2], index: 4, kind: input, shape index: {}]   ;;  %s3735_s5 = inlined_call_operand.vmem [shape: f32[64,2], index: 5, kind: output, shape index: {}]  }
   0x1   :  { %v179_v0 = vld [vmem:[%s3730_s1 + $0xf8] sm:$0xff]  ;;  %v178_v3 = vld [vmem:[%s3730_s1 + $0xf0] sm:$0xff]  ;;  %v177_v7 = vld [vmem:[%s3730_s1 + $0xe8] sm:$0xff] }
   0x2   :  { %v163_v1 = vld [vmem:[%s3730_s1 + $0x78] sm:$0xff]  ;;  %1667 = vmatprep.subr.mxu0 %v179_v0  ;;  %v162_v5 = vld [vmem:[%s3730_s1 + $0x70] sm:$0xff]  ;;  %v161_v9 = vld [vmem:[%s3730_s1 + $0x68] sm:$0xff] }
   0x3   :  { %v211_v2 = vld [vmem:[%s3730_s1 + $0x1f8] sm:$0xff]  ;;  %1668 = vmatpush3.msra.mxu0 %v163_v1  ;;  %v210_v6 = vld [vmem:[%s3730_s1 + $0x1f0] sm:$0xff]  ;;  %v209_v10 = vld [vmem:[%s3730_s1 + $0x1e8] sm:$0xff] }
   0x4   :  { %1723 = vmatprep.subr.mxu1 %v211_v2  ;;  %v195_v4 = vld [vmem:[%s3730_s1 + $0x178] sm:$0xff]  ;;  %v194_v8 = vld [vmem:[%s3730_s1 + $0x170] sm:$0xff]  ;;  %1669 = vmatprep.subr.mxu0 %v178_v3  ;;  %v176_v11 = vld [vmem:[%s3730_s1 + $0xe0] sm:$0xff] }
   0x5   :  { %1724 = vmatpush3.msra.mxu1 %v195_v4  ;;  %1670 = vmatpush3.msra.mxu0 %v162_v5  ;;  %v193_v12 = vld [vmem:[%s3730_s1 + $0x168] sm:$0xff]  ;;  %v208_v13 = vld [vmem:[%s3730_s1 + $0x1e0] sm:$0xff]  ;;  %v175_v16 = vld [vmem:[%s3730_s1 + $0xd8] sm:$0xff] }
   0x6   :  { %1725 = vmatprep.subr.mxu1 %v210_v6  ;;  %1671 = vmatprep.subr.mxu0 %v177_v7  ;;  %v160_v14 = vld [vmem:[%s3730_s1 + $0x60] sm:$0xff]  ;;  %v207_v17 = vld [vmem:[%s3730_s1 + $0x1d8] sm:$0xff]  ;;  %v174_v20 = vld [vmem:[%s3730_s1 + $0xd0] sm:$0xff] }
   0x7   :  { %1726 = vmatpush3.msra.mxu1 %v194_v8  ;;  %v192_v15 = vld [vmem:[%s3730_s1 + $0x160] sm:$0xff]  ;;  %1672 = vmatpush3.msra.mxu0 %v161_v9  ;;  %v159_v18 = vld [vmem:[%s3730_s1 + $0x58] sm:$0xff]  ;;  %v206_v21 = vld [vmem:[%s3730_s1 + $0x1d0] sm:$0xff] }
   0x8   :  { %1727 = vmatprep.subr.mxu1 %v209_v10  ;;  %1673 = vmatprep.subr.mxu0 %v176_v11  ;;  %v191_v19 = vld [vmem:[%s3730_s1 + $0x158] sm:$0xff]  ;;  %v158_v22 = vld [vmem:[%s3730_s1 + $0x50] sm:$0xff]  ;;  %v173_v24 = vld [vmem:[%s3730_s1 + $0xc8] sm:$0xff] }
   0x9   :  { %1728 = vmatpush3.msra.mxu1 %v193_v12  ;;  %1674 = vmatpush3.msra.mxu0 %v160_v14  ;;  %v190_v23 = vld [vmem:[%s3730_s1 + $0x150] sm:$0xff]  ;;  %v205_v25 = vld [vmem:[%s3730_s1 + $0x1c8] sm:$0xff]  ;;  %v172_v28 = vld [vmem:[%s3730_s1 + $0xc0] sm:$0xff] }
   0xa   :  { %1729 = vmatprep.subr.mxu1 %v208_v13  ;;  %1675 = vmatprep.subr.mxu0 %v175_v16  ;;  %v157_v26 = vld [vmem:[%s3730_s1 + $0x48] sm:$0xff]  ;;  %v204_v29 = vld [vmem:[%s3730_s1 + $0x1c0] sm:$0xff]  ;;  %v171_v32 = vld [vmem:[%s3730_s1 + $0xb8] sm:$0xff] }
   0xb   :  { %1730 = vmatpush3.msra.mxu1 %v192_v15  ;;  %1676 = vmatpush3.msra.mxu0 %v159_v18  ;;  %v189_v27 = vld [vmem:[%s3730_s1 + $0x148] sm:$0xff]  ;;  %v156_v30 = vld [vmem:[%s3730_s1 + $0x40] sm:$0xff]  ;;  %v203_v33 = vld [vmem:[%s3730_s1 + $0x1b8] sm:$0xff] }
   0xc   :  { %1731 = vmatprep.subr.mxu1 %v207_v17  ;;  %1677 = vmatprep.subr.mxu0 %v174_v20  ;;  %v188_v31 = vld [vmem:[%s3730_s1 + $0x140] sm:$0xff]  ;;  %v155_v34 = vld [vmem:[%s3730_s1 + $0x38] sm:$0xff]  ;;  %v170_v36 = vld [vmem:[%s3730_s1 + $0xb0] sm:$0xff] }
   0xd   :  { %1732 = vmatpush3.msra.mxu1 %v191_v19  ;;  %1678 = vmatpush3.msra.mxu0 %v158_v22  ;;  %v187_v35 = vld [vmem:[%s3730_s1 + $0x138] sm:$0xff]  ;;  %v202_v37 = vld [vmem:[%s3730_s1 + $0x1b0] sm:$0xff]  ;;  %v169_v40 = vld [vmem:[%s3730_s1 + $0xa8] sm:$0xff] }
   0xe   :  { %1733 = vmatprep.subr.mxu1 %v206_v21  ;;  %1679 = vmatprep.subr.mxu0 %v173_v24  ;;  %v154_v38 = vld [vmem:[%s3730_s1 + $0x30] sm:$0xff]  ;;  %v201_v41 = vld [vmem:[%s3730_s1 + $0x1a8] sm:$0xff]  ;;  %v168_v44 = vld [vmem:[%s3730_s1 + $0xa0] sm:$0xff] }
   0xf   :  { %1734 = vmatpush3.msra.mxu1 %v190_v23  ;;  %1680 = vmatpush3.msra.mxu0 %v157_v26  ;;  %v186_v39 = vld [vmem:[%s3730_s1 + $0x130] sm:$0xff]  ;;  %v153_v42 = vld [vmem:[%s3730_s1 + $0x28] sm:$0xff]  ;;  %v200_v45 = vld [vmem:[%s3730_s1 + $0x1a0] sm:$0xff] }
  0x10   :  { %1735 = vmatprep.subr.mxu1 %v205_v25  ;;  %1681 = vmatprep.subr.mxu0 %v172_v28  ;;  %v185_v43 = vld [vmem:[%s3730_s1 + $0x128] sm:$0xff]  ;;  %v152_v46 = vld [vmem:[%s3730_s1 + $0x20] sm:$0xff]  ;;  %v167_v48 = vld [vmem:[%s3730_s1 + $0x98] sm:$0xff] }
  0x11   :  { %1736 = vmatpush3.msra.mxu1 %v189_v27  ;;  %1682 = vmatpush3.msra.mxu0 %v156_v30  ;;  %v184_v47 = vld [vmem:[%s3730_s1 + $0x120] sm:$0xff]  ;;  %v199_v49 = vld [vmem:[%s3730_s1 + $0x198] sm:$0xff]  ;;  %v166_v52 = vld [vmem:[%s3730_s1 + $0x90] sm:$0xff] }
  0x12   :  { %1737 = vmatprep.subr.mxu1 %v204_v29  ;;  %1683 = vmatprep.subr.mxu0 %v171_v32  ;;  %v151_v50 = vld [vmem:[%s3730_s1 + $0x18] sm:$0xff]  ;;  %v198_v53 = vld [vmem:[%s3730_s1 + $0x190] sm:$0xff]  ;;  %v165_v56 = vld [vmem:[%s3730_s1 + $0x88] sm:$0xff] }
  0x13   :  { %1738 = vmatpush3.msra.mxu1 %v188_v31  ;;  %1684 = vmatpush3.msra.mxu0 %v155_v34  ;;  %v183_v51 = vld [vmem:[%s3730_s1 + $0x118] sm:$0xff]  ;;  %v150_v54 = vld [vmem:[%s3730_s1 + $0x10] sm:$0xff]  ;;  %v197_v57 = vld [vmem:[%s3730_s1 + $0x188] sm:$0xff] }
  0x14   :  { %1739 = vmatprep.subr.mxu1 %v203_v33  ;;  %1685 = vmatprep.subr.mxu0 %v170_v36  ;;  %v182_v55 = vld [vmem:[%s3730_s1 + $0x110] sm:$0xff]  ;;  %v149_v58 = vld [vmem:[%s3730_s1 + $0x8] sm:$0xff]  ;;  %v164_v60 = vld [vmem:[%s3730_s1 + $0x80] sm:$0xff] }
  0x15   :  { %1740 = vmatpush3.msra.mxu1 %v187_v35  ;;  %1686 = vmatpush3.msra.mxu0 %v154_v38  ;;  %v181_v59 = vld [vmem:[%s3730_s1 + $0x108] sm:$0xff]  ;;  %v148_v62 = vld [vmem:[%s3730_s1] sm:$0xff]  ;;  %v23_v2 = vld [vmem:[%s3731_s0 + $0x18] sm:$0xff] }
  0x16   :  { %1741 = vmatprep.subr.mxu1 %v202_v37  ;;  %1687 = vmatprep.subr.mxu0 %v169_v40  ;;  %v21_v61 = vld [vmem:[%s3731_s0 + $0x8] sm:$0xff]  ;;  %v196_v63 = vld [vmem:[%s3730_s1 + $0x180] sm:$0xff]  ;;  %v243_v3 = vld [vmem:[%s3730_s1 + $0x2f8] sm:$0xff] }
  0x17   :  { %1742 = vmatpush3.msra.mxu1 %v186_v39  ;;  %1688 = vmatpush3.msra.mxu0 %v153_v42  ;;  %v20_v0 = vld [vmem:[%s3731_s0] sm:$0xff]  ;;  %v22_v4 = vld [vmem:[%s3731_s0 + $0x10] sm:$0xff]  ;;  %v227_v5 = vld [vmem:[%s3730_s1 + $0x278] sm:$0xff] }
  0x18   :  { %1743 = vmatprep.subr.mxu1 %v201_v41  ;;  %1689 = vmatprep.subr.mxu0 %v168_v44  ;;  %v180_v1 = vld [vmem:[%s3730_s1 + $0x100] sm:$0xff]  ;;  %v275_v6 = vld [vmem:[%s3730_s1 + $0x3f8] sm:$0xff]  ;;  %v242_v7 = vld [vmem:[%s3730_s1 + $0x2f0] sm:$0xff] }
  0x19   :  { %1744 = vmatpush3.msra.mxu1 %v185_v43  ;;  %1690 = vmatpush3.msra.mxu0 %v152_v46  ;;  %v259_v8 = vld [vmem:[%s3730_s1 + $0x378] sm:$0xff]  ;;  %v37_v9 = vld [vmem:[%s3731_s0 + $0x88] sm:$0xff]  ;;  %v226_v10 = vld [vmem:[%s3730_s1 + $0x270] sm:$0xff] }
  0x1a   :  { %1745 = vmatprep.subr.mxu1 %v200_v45  ;;  %1691 = vmatprep.subr.mxu0 %v167_v48  ;;  %v274_v11 = vld [vmem:[%s3730_s1 + $0x3f0] sm:$0xff]  ;;  %v36_v12 = vld [vmem:[%s3731_s0 + $0x80] sm:$0xff]  ;;  %v39_v13 = vld [vmem:[%s3731_s0 + $0x98] sm:$0xff] }
  0x1b   :  { %1746 = vmatpush3.msra.mxu1 %v184_v47  ;;  %1692 = vmatpush3.msra.mxu0 %v151_v50  ;;  %v241_v14 = vld [vmem:[%s3730_s1 + $0x2e8] sm:$0xff]  ;;  %v258_v15 = vld [vmem:[%s3730_s1 + $0x370] sm:$0xff]  ;;  %v240_v19 = vld [vmem:[%s3730_s1 + $0x2e0] sm:$0xff] }
  0x1c   :  { %1747 = vmatprep.subr.mxu1 %v199_v49  ;;  %1693 = vmatprep.subr.mxu0 %v166_v52  ;;  %v38_v16 = vld [vmem:[%s3731_s0 + $0x90] sm:$0xff]  ;;  %v225_v17 = vld [vmem:[%s3730_s1 + $0x268] sm:$0xff]  ;;  %v224_v22 = vld [vmem:[%s3730_s1 + $0x260] sm:$0xff] }
  0x1d   :  { %1748 = vmatpush3.msra.mxu1 %v183_v51  ;;  %1694 = vmatpush3.msra.mxu0 %v150_v54  ;;  %v273_v18 = vld [vmem:[%s3730_s1 + $0x3e8] sm:$0xff]  ;;  %v272_v23 = vld [vmem:[%s3730_s1 + $0x3e0] sm:$0xff]  ;;  %v55_v25 = vld [vmem:[%s3731_s0 + $0x118] sm:$0xff] }
  0x1e   :  { %1749 = vmatprep.subr.mxu1 %v198_v53  ;;  %1695 = vmatprep.subr.mxu0 %v165_v56  ;;  %v257_v20 = vld [vmem:[%s3730_s1 + $0x368] sm:$0xff]  ;;  %v52_v24 = vld [vmem:[%s3731_s0 + $0x100] sm:$0xff]  ;;  %v239_v26 = vld [vmem:[%s3730_s1 + $0x2d8] sm:$0xff] }
  0x1f   :  { %1750 = vmatpush3.msra.mxu1 %v182_v55  ;;  %1696 = vmatpush3.msra.mxu0 %v149_v58  ;;  %v53_v21 = vld [vmem:[%s3731_s0 + $0x108] sm:$0xff]  ;;  %v256_v27 = vld [vmem:[%s3730_s1 + $0x360] sm:$0xff]  ;;  %v54_v28 = vld [vmem:[%s3731_s0 + $0x110] sm:$0xff] }
  0x20   :  { %1751 = vmatprep.subr.mxu1 %v197_v57  ;;  %1697 = vmatprep.subr.mxu0 %v164_v60  ;;  %v223_v29 = vld [vmem:[%s3730_s1 + $0x258] sm:$0xff]  ;;  %v238_v31 = vld [vmem:[%s3730_s1 + $0x2d0] sm:$0xff]  ;;  %v69_v33 = vld [vmem:[%s3731_s0 + $0x188] sm:$0xff] }
  0x21   :  { %1752 = vmatpush3.msra.mxu1 %v181_v59  ;;  %475 = vmatprep.mubr.f32.mxu0 %v21_v61  ;;  %v271_v30 = vld [vmem:[%s3730_s1 + $0x3d8] sm:$0xff]  ;;  %v222_v34 = vld [vmem:[%s3730_s1 + $0x250] sm:$0xff]  ;;  %v68_v36 = vld [vmem:[%s3731_s0 + $0x180] sm:$0xff] }
  0x22   :  { %1698 = vmatpush3.msra.mxu0 %v148_v62  ;;  %1753 = vmatprep.subr.mxu1 %v196_v63  ;;  %v255_v32 = vld [vmem:[%s3730_s1 + $0x358] sm:$0xff]  ;;  %v270_v35 = vld [vmem:[%s3730_s1 + $0x3d0] sm:$0xff]  ;;  %v237_v38 = vld [vmem:[%s3730_s1 + $0x2c8] sm:$0xff] }
  0x23   :  { %476 = vmatmul.mubr.f32.vlgmr.msra.gmra.mxu0 %v20_v0  ;;  %1754 = vmatpush3.msra.mxu1 %v180_v1  ;;  %v71_v37 = vld [vmem:[%s3731_s0 + $0x198] sm:$0xff]  ;;  %v254_v39 = vld [vmem:[%s3730_s1 + $0x350] sm:$0xff]  ;;  %v221_v41 = vld [vmem:[%s3730_s1 + $0x248] sm:$0xff] }
  0x24   :  { %580 = vmatprep.mubr.f32.mxu1 %v23_v2  ;;  %1779 = vmatprep.subr.mxu0 %v243_v3  ;;  %v70_v40 = vld [vmem:[%s3731_s0 + $0x190] sm:$0xff]  ;;  %v269_v42 = vld [vmem:[%s3730_s1 + $0x3c8] sm:$0xff]  ;;  %v236_v43 = vld [vmem:[%s3730_s1 + $0x2c0] sm:$0xff] }
  0x25   :  { %581 = vmatmul.mubr.f32.vlgmr.msra.gmra.mxu1 %v22_v4  ;;  %1780 = vmatpush3.msra.mxu0 %v227_v5  ;;  %v253_v44 = vld [vmem:[%s3730_s1 + $0x348] sm:$0xff]  ;;  %v220_v46 = vld [vmem:[%s3730_s1 + $0x240] sm:$0xff]  ;;  %v87_v49 = vld [vmem:[%s3731_s0 + $0x218] sm:$0xff] }
  0x26   :  { %1835 = vmatprep.subr.mxu1 %v275_v6  ;;  %1781 = vmatprep.subr.mxu0 %v242_v7  ;;  %v85_v45 = vld [vmem:[%s3731_s0 + $0x208] sm:$0xff]  ;;  %v268_v47 = vld [vmem:[%s3730_s1 + $0x3c0] sm:$0xff]  ;;  %v235_v50 = vld [vmem:[%s3730_s1 + $0x2b8] sm:$0xff] }
  0x27   :  { %1836 = vmatpush3.msra.mxu1 %v259_v8  ;;  %480 = vmatprep.mubr.f32.mxu0 %v37_v9  ;;  %v84_v48 = vld [vmem:[%s3731_s0 + $0x200] sm:$0xff]  ;;  %v86_v52 = vld [vmem:[%s3731_s0 + $0x210] sm:$0xff]  ;;  %v219_v53 = vld [vmem:[%s3730_s1 + $0x238] sm:$0xff] }
  0x28   :  { %1782 = vmatpush3.msra.mxu0 %v226_v10  ;;  %1837 = vmatprep.subr.mxu1 %v274_v11  ;;  %v252_v51 = vld [vmem:[%s3730_s1 + $0x340] sm:$0xff]  ;;  %v267_v54 = vld [vmem:[%s3730_s1 + $0x3b8] sm:$0xff]  ;;  %v234_v55 = vld [vmem:[%s3730_s1 + $0x2b0] sm:$0xff] }
  0x29   :  { %481 = vmatmul.mubr.f32.gmra.mxu0 %v36_v12  ;;  %585 = vmatprep.mubr.f32.mxu1 %v39_v13  ;;  %v251_v56 = vld [vmem:[%s3730_s1 + $0x338] sm:$0xff]  ;;  %v101_v57 = vld [vmem:[%s3731_s0 + $0x288] sm:$0xff]  ;;  %v218_v58 = vld [vmem:[%s3730_s1 + $0x230] sm:$0xff] }
  0x2a   :  { %1783 = vmatprep.subr.mxu0 %v241_v14  ;;  %1838 = vmatpush3.msra.mxu1 %v258_v15  ;;  %v266_v59 = vld [vmem:[%s3730_s1 + $0x3b0] sm:$0xff]  ;;  %v100_v60 = vld [vmem:[%s3731_s0 + $0x280] sm:$0xff]  ;;  %v103_v61 = vld [vmem:[%s3731_s0 + $0x298] sm:$0xff] }
  0x2b   :  { %586 = vmatmul.mubr.f32.gmra.mxu1 %v38_v16  ;;  %1784 = vmatpush3.msra.mxu0 %v225_v17  ;;  %v233_v62 = vld [vmem:[%s3730_s1 + $0x2a8] sm:$0xff]  ;;  %v250_v63 = vld [vmem:[%s3730_s1 + $0x330] sm:$0xff]  ;;  %v232_v3 = vld [vmem:[%s3730_s1 + $0x2a0] sm:$0xff] }
  0x2c   :  { %1839 = vmatprep.subr.mxu1 %v273_v18  ;;  %1785 = vmatprep.subr.mxu0 %v240_v19  ;;  %v102_v0 = vld [vmem:[%s3731_s0 + $0x290] sm:$0xff]  ;;  %v217_v1 = vld [vmem:[%s3730_s1 + $0x228] sm:$0xff]  ;;  %v216_v6 = vld [vmem:[%s3730_s1 + $0x220] sm:$0xff] }
  0x2d   :  { %1840 = vmatpush3.msra.mxu1 %v257_v20  ;;  %485 = vmatprep.mubr.f32.mxu0 %v53_v21  ;;  %v265_v2 = vld [vmem:[%s3730_s1 + $0x3a8] sm:$0xff]  ;;  %v264_v7 = vld [vmem:[%s3730_s1 + $0x3a0] sm:$0xff]  ;;  %v119_v9 = vld [vmem:[%s3731_s0 + $0x318] sm:$0xff] }
  0x2e   :  { %1786 = vmatpush3.msra.mxu0 %v224_v22  ;;  %1841 = vmatprep.subr.mxu1 %v272_v23  ;;  %v249_v4 = vld [vmem:[%s3730_s1 + $0x328] sm:$0xff]  ;;  %v116_v8 = vld [vmem:[%s3731_s0 + $0x300] sm:$0xff]  ;;  %v231_v10 = vld [vmem:[%s3730_s1 + $0x298] sm:$0xff] }
  0x2f   :  { %486 = vmatmul.mubr.f32.gmra.mxu0 %v52_v24  ;;  %590 = vmatprep.mubr.f32.mxu1 %v55_v25  ;;  %v117_v5 = vld [vmem:[%s3731_s0 + $0x308] sm:$0xff]  ;;  %v248_v11 = vld [vmem:[%s3730_s1 + $0x320] sm:$0xff]  ;;  %v118_v12 = vld [vmem:[%s3731_s0 + $0x310] sm:$0xff] }
  0x30   :  { %1787 = vmatprep.subr.mxu0 %v239_v26  ;;  %1842 = vmatpush3.msra.mxu1 %v256_v27  ;;  %v215_v13 = vld [vmem:[%s3730_s1 + $0x218] sm:$0xff]  ;;  %v230_v15 = vld [vmem:[%s3730_s1 + $0x290] sm:$0xff]  ;;  %v133_v17 = vld [vmem:[%s3731_s0 + $0x388] sm:$0xff] }
  0x31   :  { %591 = vmatmul.mubr.f32.gmra.mxu1 %v54_v28  ;;  %1788 = vmatpush3.msra.mxu0 %v223_v29  ;;  %v263_v14 = vld [vmem:[%s3730_s1 + $0x398] sm:$0xff]  ;;  %v214_v18 = vld [vmem:[%s3730_s1 + $0x210] sm:$0xff]  ;;  %v132_v20 = vld [vmem:[%s3731_s0 + $0x380] sm:$0xff] }
  0x32   :  { %1843 = vmatprep.subr.mxu1 %v271_v30  ;;  %1789 = vmatprep.subr.mxu0 %v238_v31  ;;  %v247_v16 = vld [vmem:[%s3730_s1 + $0x318] sm:$0xff]  ;;  %v262_v19 = vld [vmem:[%s3730_s1 + $0x390] sm:$0xff]  ;;  %v229_v22 = vld [vmem:[%s3730_s1 + $0x288] sm:$0xff] }
  0x33   :  { %1844 = vmatpush3.msra.mxu1 %v255_v32  ;;  %490 = vmatprep.mubr.f32.mxu0 %v69_v33  ;;  %v135_v21 = vld [vmem:[%s3731_s0 + $0x398] sm:$0xff]  ;;  %v246_v23 = vld [vmem:[%s3730_s1 + $0x310] sm:$0xff]  ;;  %v213_v25 = vld [vmem:[%s3730_s1 + $0x208] sm:$0xff] }
  0x34   :  { %1790 = vmatpush3.msra.mxu0 %v222_v34  ;;  %1845 = vmatprep.subr.mxu1 %v270_v35  ;;  %v134_v24 = vld [vmem:[%s3731_s0 + $0x390] sm:$0xff]  ;;  %v261_v26 = vld [vmem:[%s3730_s1 + $0x388] sm:$0xff]  ;;  %v228_v27 = vld [vmem:[%s3730_s1 + $0x280] sm:$0xff] }
  0x35   :  { %491 = vmatmul.mubr.f32.gmra.mxu0 %v68_v36  ;;  %595 = vmatprep.mubr.f32.mxu1 %v71_v37  ;;  %v245_v28 = vld [vmem:[%s3730_s1 + $0x308] sm:$0xff]  ;;  %v212_v29 = vld [vmem:[%s3730_s1 + $0x200] sm:$0xff]  ;;  %v27_v34 = vld [vmem:[%s3731_s0 + $0x38] sm:$0xff] }
  0x36   :  { %1791 = vmatprep.subr.mxu0 %v237_v38  ;;  %1846 = vmatpush3.msra.mxu1 %v254_v39  ;;  %v25_v30 = vld [vmem:[%s3731_s0 + $0x28] sm:$0xff]  ;;  %v260_v31 = vld [vmem:[%s3730_s1 + $0x380] sm:$0xff]  ;;  %v307_v35 = vld [vmem:[%s3730_s1 + $0x4f8] sm:$0xff] }
  0x37   :  { %596 = vmatmul.mubr.f32.gmra.mxu1 %v70_v40  ;;  %1792 = vmatpush3.msra.mxu0 %v221_v41  ;;  %v24_v32 = vld [vmem:[%s3731_s0 + $0x20] sm:$0xff]  ;;  %v26_v36 = vld [vmem:[%s3731_s0 + $0x30] sm:$0xff]  ;;  %v291_v37 = vld [vmem:[%s3730_s1 + $0x478] sm:$0xff] }
  0x38   :  { %1847 = vmatprep.subr.mxu1 %v269_v42  ;;  %1793 = vmatprep.subr.mxu0 %v236_v43  ;;  %v244_v33 = vld [vmem:[%s3730_s1 + $0x300] sm:$0xff]  ;;  %v339_v38 = vld [vmem:[%s3730_s1 + $0x5f8] sm:$0xff]  ;;  %v306_v39 = vld [vmem:[%s3730_s1 + $0x4f0] sm:$0xff] }
  0x39   :  { %1848 = vmatpush3.msra.mxu1 %v253_v44  ;;  %495 = vmatprep.mubr.f32.mxu0 %v85_v45  ;;  %v323_v40 = vld [vmem:[%s3730_s1 + $0x578] sm:$0xff]  ;;  %v41_v41 = vld [vmem:[%s3731_s0 + $0xa8] sm:$0xff]  ;;  %v290_v42 = vld [vmem:[%s3730_s1 + $0x470] sm:$0xff] }
  0x3a   :  { %1794 = vmatpush3.msra.mxu0 %v220_v46  ;;  %1849 = vmatprep.subr.mxu1 %v268_v47  ;;  %v338_v43 = vld [vmem:[%s3730_s1 + $0x5f0] sm:$0xff]  ;;  %v40_v44 = vld [vmem:[%s3731_s0 + $0xa0] sm:$0xff]  ;;  %v43_v45 = vld [vmem:[%s3731_s0 + $0xb8] sm:$0xff] }
  0x3b   :  { %496 = vmatmul.mubr.f32.gmra.mxu0 %v84_v48  ;;  %600 = vmatprep.mubr.f32.mxu1 %v87_v49  ;;  %v305_v46 = vld [vmem:[%s3730_s1 + $0x4e8] sm:$0xff]  ;;  %v322_v47 = vld [vmem:[%s3730_s1 + $0x570] sm:$0xff] }
  0x3c   :  { %1795 = vmatprep.subr.mxu0 %v235_v50  ;;  %1850 = vmatpush3.msra.mxu1 %v252_v51  ;;  %v42_v48 = vld [vmem:[%s3731_s0 + $0xb0] sm:$0xff]  ;;  %v289_v49 = vld [vmem:[%s3730_s1 + $0x468] sm:$0xff]  ;;  %v304_v51 = vld [vmem:[%s3730_s1 + $0x4e0] sm:$0xff] }
  0x3d   :  { %601 = vmatmul.mubr.f32.gmra.mxu1 %v86_v52  ;;  %1796 = vmatpush3.msra.mxu0 %v219_v53  ;;  %v337_v50 = vld [vmem:[%s3730_s1 + $0x5e8] sm:$0xff] }
  0x3e   :  { %1851 = vmatprep.subr.mxu1 %v267_v54  ;;  %1797 = vmatprep.subr.mxu0 %v234_v55  ;;  %v321_v52 = vld [vmem:[%s3730_s1 + $0x568] sm:$0xff]  ;;  %v288_v54 = vld [vmem:[%s3730_s1 + $0x460] sm:$0xff] }
  0x3f   :  { %1852 = vmatpush3.msra.mxu1 %v251_v56  ;;  %500 = vmatprep.mubr.f32.mxu0 %v101_v57  ;;  %v57_v53 = vld [vmem:[%s3731_s0 + $0x128] sm:$0xff]  ;;  %v336_v55 = vld [vmem:[%s3730_s1 + $0x5e0] sm:$0xff]  ;;  %v59_v57 = vld [vmem:[%s3731_s0 + $0x138] sm:$0xff] }
  0x40   :  { %1798 = vmatpush3.msra.mxu0 %v218_v58  ;;  %1853 = vmatprep.subr.mxu1 %v266_v59  ;;  %v56_v56 = vld [vmem:[%s3731_s0 + $0x120] sm:$0xff]  ;;  %v303_v58 = vld [vmem:[%s3730_s1 + $0x4d8] sm:$0xff] }
  0x41   :  { %501 = vmatmul.mubr.f32.gmra.mxu0 %v100_v60  ;;  %605 = vmatprep.mubr.f32.mxu1 %v103_v61  ;;  %v320_v59 = vld [vmem:[%s3730_s1 + $0x560] sm:$0xff]  ;;  %v58_v60 = vld [vmem:[%s3731_s0 + $0x130] sm:$0xff]  ;;  %v287_v61 = vld [vmem:[%s3730_s1 + $0x458] sm:$0xff] }
  0x42   :  { %1799 = vmatprep.subr.mxu0 %v233_v62  ;;  %1854 = vmatpush3.msra.mxu1 %v250_v63  ;;  %v335_v62 = vld [vmem:[%s3730_s1 + $0x5d8] sm:$0xff]  ;;  %v302_v63 = vld [vmem:[%s3730_s1 + $0x4d0] sm:$0xff] }
  0x43   :  { %606 = vmatmul.mubr.f32.gmra.mxu1 %v102_v0  ;;  %1800 = vmatpush3.msra.mxu0 %v217_v1  ;;  %v319_v0 = vld [vmem:[%s3730_s1 + $0x558] sm:$0xff]  ;;  %v73_v1 = vld [vmem:[%s3731_s0 + $0x1a8] sm:$0xff] }
  0x44   :  { %1855 = vmatprep.subr.mxu1 %v265_v2  ;;  %1801 = vmatprep.subr.mxu0 %v232_v3  ;;  %v286_v2 = vld [vmem:[%s3730_s1 + $0x450] sm:$0xff] }
  0x45   :  { %1856 = vmatpush3.msra.mxu1 %v249_v4  ;;  %505 = vmatprep.mubr.f32.mxu0 %v117_v5  ;;  %v334_v3 = vld [vmem:[%s3730_s1 + $0x5d0] sm:$0xff]  ;;  %v72_v4 = vld [vmem:[%s3731_s0 + $0x1a0] sm:$0xff]  ;;  %v75_v5 = vld [vmem:[%s3731_s0 + $0x1b8] sm:$0xff] }
  0x46   :  { %1802 = vmatpush3.msra.mxu0 %v216_v6  ;;  %1857 = vmatprep.subr.mxu1 %v264_v7  ;;  %v301_v6 = vld [vmem:[%s3730_s1 + $0x4c8] sm:$0xff]  ;;  %v318_v7 = vld [vmem:[%s3730_s1 + $0x550] sm:$0xff] }
  0x47   :  { %506 = vmatmul.mubr.f32.gmra.mxu0 %v116_v8  ;;  %610 = vmatprep.mubr.f32.mxu1 %v119_v9  ;;  %v74_v8 = vld [vmem:[%s3731_s0 + $0x1b0] sm:$0xff]  ;;  %v285_v9 = vld [vmem:[%s3730_s1 + $0x448] sm:$0xff] }
  0x48   :  { %1803 = vmatprep.subr.mxu0 %v231_v10  ;;  %1858 = vmatpush3.msra.mxu1 %v248_v11  ;;  %v333_v10 = vld [vmem:[%s3730_s1 + $0x5c8] sm:$0xff]  ;;  %v300_v11 = vld [vmem:[%s3730_s1 + $0x4c0] sm:$0xff] }
  0x49   :  { %611 = vmatmul.mubr.f32.gmra.mxu1 %v118_v12  ;;  %1804 = vmatpush3.msra.mxu0 %v215_v13  ;;  %v317_v12 = vld [vmem:[%s3730_s1 + $0x548] sm:$0xff] }
  0x4a   :  { %1859 = vmatprep.subr.mxu1 %v263_v14  ;;  %1805 = vmatprep.subr.mxu0 %v230_v15  ;;  %v89_v13 = vld [vmem:[%s3731_s0 + $0x228] sm:$0xff]  ;;  %v284_v14 = vld [vmem:[%s3730_s1 + $0x440] sm:$0xff] }
  0x4b   :  { %1860 = vmatpush3.msra.mxu1 %v247_v16  ;;  %510 = vmatprep.mubr.f32.mxu0 %v133_v17  ;;  %v332_v15 = vld [vmem:[%s3730_s1 + $0x5c0] sm:$0xff]  ;;  %v91_v17 = vld [vmem:[%s3731_s0 + $0x238] sm:$0xff] }
  0x4c   :  { %1806 = vmatpush3.msra.mxu0 %v214_v18  ;;  %1861 = vmatprep.subr.mxu1 %v262_v19  ;;  %v88_v16 = vld [vmem:[%s3731_s0 + $0x220] sm:$0xff]  ;;  %v299_v18 = vld [vmem:[%s3730_s1 + $0x4b8] sm:$0xff] }
  0x4d   :  { %511 = vmatmul.mubr.f32.gmra.mxu0 %v132_v20  ;;  %615 = vmatprep.mubr.f32.mxu1 %v135_v21  ;;  %v316_v19 = vld [vmem:[%s3730_s1 + $0x540] sm:$0xff]  ;;  %v90_v20 = vld [vmem:[%s3731_s0 + $0x230] sm:$0xff]  ;;  %v283_v21 = vld [vmem:[%s3730_s1 + $0x438] sm:$0xff] }
  0x4e   :  { %1807 = vmatprep.subr.mxu0 %v229_v22  ;;  %1862 = vmatpush3.msra.mxu1 %v246_v23  ;;  %v331_v22 = vld [vmem:[%s3730_s1 + $0x5b8] sm:$0xff]  ;;  %v298_v23 = vld [vmem:[%s3730_s1 + $0x4b0] sm:$0xff] }
  0x4f   :  { %616 = vmatmul.mubr.f32.gmra.mxu1 %v134_v24  ;;  %1808 = vmatpush3.msra.mxu0 %v213_v25  ;;  %v315_v24 = vld [vmem:[%s3730_s1 + $0x538] sm:$0xff]  ;;  %v105_v25 = vld [vmem:[%s3731_s0 + $0x2a8] sm:$0xff] }
  0x50   :  { %1863 = vmatprep.subr.mxu1 %v261_v26  ;;  %1809 = vmatprep.subr.mxu0 %v228_v27  ;;  %v282_v26 = vld [vmem:[%s3730_s1 + $0x430] sm:$0xff] }
  0x51   :  { %1864 = vmatpush3.msra.mxu1 %v245_v28  ;;  %1810 = vmatpush3.msra.mxu0 %v212_v29  ;;  %v330_v27 = vld [vmem:[%s3730_s1 + $0x5b0] sm:$0xff]  ;;  %v104_v28 = vld [vmem:[%s3731_s0 + $0x2a0] sm:$0xff]  ;;  %v107_v29 = vld [vmem:[%s3731_s0 + $0x2b8] sm:$0xff] }
  0x52   :  { %685 = vmatprep.mubr.f32.mxu0 %v25_v30  ;;  %1865 = vmatprep.subr.mxu1 %v260_v31  ;;  %v297_v30 = vld [vmem:[%s3730_s1 + $0x4a8] sm:$0xff]  ;;  %v314_v31 = vld [vmem:[%s3730_s1 + $0x530] sm:$0xff] }
  0x53   :  { %686 = vmatmul.mubr.f32.vlgmr.msra.gmra.mxu0 %v24_v32  ;;  %1866 = vmatpush3.msra.mxu1 %v244_v33  ;;  %v106_v32 = vld [vmem:[%s3731_s0 + $0x2b0] sm:$0xff]  ;;  %v281_v33 = vld [vmem:[%s3730_s1 + $0x428] sm:$0xff] }
  0x54   :  { %790 = vmatprep.mubr.f32.mxu1 %v27_v34  ;;  %1891 = vmatprep.subr.mxu0 %v307_v35  ;;  %v329_v34 = vld [vmem:[%s3730_s1 + $0x5a8] sm:$0xff]  ;;  %v296_v35 = vld [vmem:[%s3730_s1 + $0x4a0] sm:$0xff] }
  0x55   :  { %791 = vmatmul.mubr.f32.vlgmr.msra.gmra.mxu1 %v26_v36  ;;  %1892 = vmatpush3.msra.mxu0 %v291_v37  ;;  %v313_v36 = vld [vmem:[%s3730_s1 + $0x528] sm:$0xff] }
  0x56   :  { %1947 = vmatprep.subr.mxu1 %v339_v38  ;;  %1893 = vmatprep.subr.mxu0 %v306_v39  ;;  %v121_v37 = vld [vmem:[%s3731_s0 + $0x328] sm:$0xff]  ;;  %v280_v38 = vld [vmem:[%s3730_s1 + $0x420] sm:$0xff] }
  0x57   :  { %1948 = vmatpush3.msra.mxu1 %v323_v40  ;;  %690 = vmatprep.mubr.f32.mxu0 %v41_v41  ;;  %v328_v39 = vld [vmem:[%s3730_s1 + $0x5a0] sm:$0xff]  ;;  %v123_v41 = vld [vmem:[%s3731_s0 + $0x338] sm:$0xff] }
  0x58   :  { %1894 = vmatpush3.msra.mxu0 %v290_v42  ;;  %1949 = vmatprep.subr.mxu1 %v338_v43  ;;  %v120_v40 = vld [vmem:[%s3731_s0 + $0x320] sm:$0xff]  ;;  %v295_v42 = vld [vmem:[%s3730_s1 + $0x498] sm:$0xff] }
  0x59   :  { %691 = vmatmul.mubr.f32.gmra.mxu0 %v40_v44  ;;  %795 = vmatprep.mubr.f32.mxu1 %v43_v45  ;;  %v312_v43 = vld [vmem:[%s3730_s1 + $0x520] sm:$0xff]  ;;  %v122_v44 = vld [vmem:[%s3731_s0 + $0x330] sm:$0xff]  ;;  %v279_v45 = vld [vmem:[%s3730_s1 + $0x418] sm:$0xff] }
  0x5a   :  { %1895 = vmatprep.subr.mxu0 %v305_v46  ;;  %1950 = vmatpush3.msra.mxu1 %v322_v47  ;;  %v327_v46 = vld [vmem:[%s3730_s1 + $0x598] sm:$0xff]  ;;  %v294_v47 = vld [vmem:[%s3730_s1 + $0x490] sm:$0xff] }
  0x5b   :  { %796 = vmatmul.mubr.f32.gmra.mxu1 %v42_v48  ;;  %1896 = vmatpush3.msra.mxu0 %v289_v49  ;;  %v311_v48 = vld [vmem:[%s3730_s1 + $0x518] sm:$0xff]  ;;  %v137_v49 = vld [vmem:[%s3731_s0 + $0x3a8] sm:$0xff] }
  0x5c   :  { %1951 = vmatprep.subr.mxu1 %v337_v50  ;;  %1897 = vmatprep.subr.mxu0 %v304_v51  ;;  %v278_v50 = vld [vmem:[%s3730_s1 + $0x410] sm:$0xff] }
  0x5d   :  { %1952 = vmatpush3.msra.mxu1 %v321_v52  ;;  %695 = vmatprep.mubr.f32.mxu0 %v57_v53  ;;  %v326_v51 = vld [vmem:[%s3730_s1 + $0x590] sm:$0xff]  ;;  %v136_v52 = vld [vmem:[%s3731_s0 + $0x3a0] sm:$0xff]  ;;  %v139_v53 = vld [vmem:[%s3731_s0 + $0x3b8] sm:$0xff] }
  0x5e   :  { %1898 = vmatpush3.msra.mxu0 %v288_v54  ;;  %1953 = vmatprep.subr.mxu1 %v336_v55  ;;  %v293_v54 = vld [vmem:[%s3730_s1 + $0x488] sm:$0xff]  ;;  %v310_v55 = vld [vmem:[%s3730_s1 + $0x510] sm:$0xff] }
  0x5f   :  { %696 = vmatmul.mubr.f32.gmra.mxu0 %v56_v56  ;;  %800 = vmatprep.mubr.f32.mxu1 %v59_v57  ;;  %v138_v56 = vld [vmem:[%s3731_s0 + $0x3b0] sm:$0xff]  ;;  %v277_v57 = vld [vmem:[%s3730_s1 + $0x408] sm:$0xff] }
  0x60   :  { %1899 = vmatprep.subr.mxu0 %v303_v58  ;;  %1954 = vmatpush3.msra.mxu1 %v320_v59  ;;  %v325_v58 = vld [vmem:[%s3730_s1 + $0x588] sm:$0xff]  ;;  %v292_v59 = vld [vmem:[%s3730_s1 + $0x480] sm:$0xff] }
  0x61   :  { %801 = vmatmul.mubr.f32.gmra.mxu1 %v58_v60  ;;  %1900 = vmatpush3.msra.mxu0 %v287_v61  ;;  %v309_v60 = vld [vmem:[%s3730_s1 + $0x508] sm:$0xff]  ;;  %v276_v61 = vld [vmem:[%s3730_s1 + $0x400] sm:$0xff] }
  0x62   :  { %1955 = vmatprep.subr.mxu1 %v335_v62  ;;  %1901 = vmatprep.subr.mxu0 %v302_v63  ;;  %v29_v62 = vld [vmem:[%s3731_s0 + $0x48] sm:$0xff]  ;;  %v324_v63 = vld [vmem:[%s3730_s1 + $0x580] sm:$0xff] }
  0x63   :  { %1956 = vmatpush3.msra.mxu1 %v319_v0  ;;  %700 = vmatprep.mubr.f32.mxu0 %v73_v1  ;;  %v28_v0 = vld [vmem:[%s3731_s0 + $0x40] sm:$0xff] }
  0x64   :  { %1902 = vmatpush3.msra.mxu0 %v286_v2  ;;  %1957 = vmatprep.subr.mxu1 %v334_v3  ;;  %v308_v1 = vld [vmem:[%s3730_s1 + $0x500] sm:$0xff]  ;;  %v31_v2 = vld [vmem:[%s3731_s0 + $0x58] sm:$0xff] }
  0x65   :  { %701 = vmatmul.mubr.f32.gmra.mxu0 %v72_v4  ;;  %805 = vmatprep.mubr.f32.mxu1 %v75_v5  ;;  %v371_v3 = vld [vmem:[%s3730_s1 + $0x6f8] sm:$0xff]  ;;  %v30_v4 = vld [vmem:[%s3731_s0 + $0x50] sm:$0xff] }
  0x66   :  { %1903 = vmatprep.subr.mxu0 %v301_v6  ;;  %1958 = vmatpush3.msra.mxu1 %v318_v7  ;;  %v355_v5 = vld [vmem:[%s3730_s1 + $0x678] sm:$0xff]  ;;  %v370_v7 = vld [vmem:[%s3730_s1 + $0x6f0] sm:$0xff] }
  0x67   :  { %806 = vmatmul.mubr.f32.gmra.mxu1 %v74_v8  ;;  %1904 = vmatpush3.msra.mxu0 %v285_v9  ;;  %v403_v6 = vld [vmem:[%s3730_s1 + $0x7f8] sm:$0xff]  ;;  %v45_v9 = vld [vmem:[%s3731_s0 + $0xc8] sm:$0xff] }
  0x68   :  { %1959 = vmatprep.subr.mxu1 %v333_v10  ;;  %1905 = vmatprep.subr.mxu0 %v300_v11  ;;  %v387_v8 = vld [vmem:[%s3730_s1 + $0x778] sm:$0xff]  ;;  %v354_v10 = vld [vmem:[%s3730_s1 + $0x670] sm:$0xff] }
  0x69   :  { %1960 = vmatpush3.msra.mxu1 %v317_v12  ;;  %705 = vmatprep.mubr.f32.mxu0 %v89_v13  ;;  %v402_v11 = vld [vmem:[%s3730_s1 + $0x7f0] sm:$0xff]  ;;  %v44_v12 = vld [vmem:[%s3731_s0 + $0xc0] sm:$0xff]  ;;  %v47_v13 = vld [vmem:[%s3731_s0 + $0xd8] sm:$0xff] }
  0x6a   :  { %1906 = vmatpush3.msra.mxu0 %v284_v14  ;;  %1961 = vmatprep.subr.mxu1 %v332_v15  ;;  %v369_v14 = vld [vmem:[%s3730_s1 + $0x6e8] sm:$0xff]  ;;  %v386_v15 = vld [vmem:[%s3730_s1 + $0x770] sm:$0xff] }
  0x6b   :  { %706 = vmatmul.mubr.f32.gmra.mxu0 %v88_v16  ;;  %810 = vmatprep.mubr.f32.mxu1 %v91_v17  ;;  %v46_v16 = vld [vmem:[%s3731_s0 + $0xd0] sm:$0xff]  ;;  %v353_v17 = vld [vmem:[%s3730_s1 + $0x668] sm:$0xff] }
  0x6c   :  { %1907 = vmatprep.subr.mxu0 %v299_v18  ;;  %1962 = vmatpush3.msra.mxu1 %v316_v19  ;;  %v401_v18 = vld [vmem:[%s3730_s1 + $0x7e8] sm:$0xff]  ;;  %v368_v19 = vld [vmem:[%s3730_s1 + $0x6e0] sm:$0xff] }
  0x6d   :  { %811 = vmatmul.mubr.f32.gmra.mxu1 %v90_v20  ;;  %1908 = vmatpush3.msra.mxu0 %v283_v21  ;;  %v385_v20 = vld [vmem:[%s3730_s1 + $0x768] sm:$0xff] }
  0x6e   :  { %1963 = vmatprep.subr.mxu1 %v331_v22  ;;  %1909 = vmatprep.subr.mxu0 %v298_v23  ;;  %v61_v21 = vld [vmem:[%s3731_s0 + $0x148] sm:$0xff]  ;;  %v352_v22 = vld [vmem:[%s3730_s1 + $0x660] sm:$0xff] }
  0x6f   :  { %1964 = vmatpush3.msra.mxu1 %v315_v24  ;;  %710 = vmatprep.mubr.f32.mxu0 %v105_v25  ;;  %v400_v23 = vld [vmem:[%s3730_s1 + $0x7e0] sm:$0xff]  ;;  %v63_v25 = vld [vmem:[%s3731_s0 + $0x158] sm:$0xff] }
  0x70   :  { %1910 = vmatpush3.msra.mxu0 %v282_v26  ;;  %1965 = vmatprep.subr.mxu1 %v330_v27  ;;  %v60_v24 = vld [vmem:[%s3731_s0 + $0x140] sm:$0xff]  ;;  %v367_v26 = vld [vmem:[%s3730_s1 + $0x6d8] sm:$0xff] }
  0x71   :  { %711 = vmatmul.mubr.f32.gmra.mxu0 %v104_v28  ;;  %815 = vmatprep.mubr.f32.mxu1 %v107_v29  ;;  %v384_v27 = vld [vmem:[%s3730_s1 + $0x760] sm:$0xff]  ;;  %v62_v28 = vld [vmem:[%s3731_s0 + $0x150] sm:$0xff]  ;;  %v351_v29 = vld [vmem:[%s3730_s1 + $0x658] sm:$0xff] }
  0x72   :  { %1911 = vmatprep.subr.mxu0 %v297_v30  ;;  %1966 = vmatpush3.msra.mxu1 %v314_v31  ;;  %v399_v30 = vld [vmem:[%s3730_s1 + $0x7d8] sm:$0xff]  ;;  %v366_v31 = vld [vmem:[%s3730_s1 + $0x6d0] sm:$0xff] }
  0x73   :  { %816 = vmatmul.mubr.f32.gmra.mxu1 %v106_v32  ;;  %1912 = vmatpush3.msra.mxu0 %v281_v33  ;;  %v383_v32 = vld [vmem:[%s3730_s1 + $0x758] sm:$0xff]  ;;  %v77_v33 = vld [vmem:[%s3731_s0 + $0x1c8] sm:$0xff] }
  0x74   :  { %1967 = vmatprep.subr.mxu1 %v329_v34  ;;  %1913 = vmatprep.subr.mxu0 %v296_v35  ;;  %v350_v34 = vld [vmem:[%s3730_s1 + $0x650] sm:$0xff] }
  0x75   :  { %1968 = vmatpush3.msra.mxu1 %v313_v36  ;;  %715 = vmatprep.mubr.f32.mxu0 %v121_v37  ;;  %v398_v35 = vld [vmem:[%s3730_s1 + $0x7d0] sm:$0xff]  ;;  %v76_v36 = vld [vmem:[%s3731_s0 + $0x1c0] sm:$0xff]  ;;  %v79_v37 = vld [vmem:[%s3731_s0 + $0x1d8] sm:$0xff] }
  0x76   :  { %1914 = vmatpush3.msra.mxu0 %v280_v38  ;;  %1969 = vmatprep.subr.mxu1 %v328_v39  ;;  %v365_v38 = vld [vmem:[%s3730_s1 + $0x6c8] sm:$0xff]  ;;  %v382_v39 = vld [vmem:[%s3730_s1 + $0x750] sm:$0xff] }
  0x77   :  { %716 = vmatmul.mubr.f32.gmra.mxu0 %v120_v40  ;;  %820 = vmatprep.mubr.f32.mxu1 %v123_v41  ;;  %v78_v40 = vld [vmem:[%s3731_s0 + $0x1d0] sm:$0xff]  ;;  %v349_v41 = vld [vmem:[%s3730_s1 + $0x648] sm:$0xff] }
  0x78   :  { %1915 = vmatprep.subr.mxu0 %v295_v42  ;;  %1970 = vmatpush3.msra.mxu1 %v312_v43  ;;  %v397_v42 = vld [vmem:[%s3730_s1 + $0x7c8] sm:$0xff]  ;;  %v364_v43 = vld [vmem:[%s3730_s1 + $0x6c0] sm:$0xff] }
  0x79   :  { %821 = vmatmul.mubr.f32.gmra.mxu1 %v122_v44  ;;  %1916 = vmatpush3.msra.mxu0 %v279_v45  ;;  %v381_v44 = vld [vmem:[%s3730_s1 + $0x748] sm:$0xff] }
  0x7a   :  { %1971 = vmatprep.subr.mxu1 %v327_v46  ;;  %1917 = vmatprep.subr.mxu0 %v294_v47  ;;  %v93_v45 = vld [vmem:[%s3731_s0 + $0x248] sm:$0xff]  ;;  %v348_v46 = vld [vmem:[%s3730_s1 + $0x640] sm:$0xff] }
  0x7b   :  { %1972 = vmatpush3.msra.mxu1 %v311_v48  ;;  %720 = vmatprep.mubr.f32.mxu0 %v137_v49  ;;  %v396_v47 = vld [vmem:[%s3730_s1 + $0x7c0] sm:$0xff]  ;;  %v95_v49 = vld [vmem:[%s3731_s0 + $0x258] sm:$0xff] }
  0x7c   :  { %1918 = vmatpush3.msra.mxu0 %v278_v50  ;;  %1973 = vmatprep.subr.mxu1 %v326_v51  ;;  %v92_v48 = vld [vmem:[%s3731_s0 + $0x240] sm:$0xff]  ;;  %v363_v50 = vld [vmem:[%s3730_s1 + $0x6b8] sm:$0xff] }
  0x7d   :  { %721 = vmatmul.mubr.f32.gmra.mxu0 %v136_v52  ;;  %825 = vmatprep.mubr.f32.mxu1 %v139_v53  ;;  %v380_v51 = vld [vmem:[%s3730_s1 + $0x740] sm:$0xff]  ;;  %v94_v52 = vld [vmem:[%s3731_s0 + $0x250] sm:$0xff]  ;;  %v347_v53 = vld [vmem:[%s3730_s1 + $0x638] sm:$0xff] }
  0x7e   :  { %1919 = vmatprep.subr.mxu0 %v293_v54  ;;  %1974 = vmatpush3.msra.mxu1 %v310_v55  ;;  %v395_v54 = vld [vmem:[%s3730_s1 + $0x7b8] sm:$0xff]  ;;  %v362_v55 = vld [vmem:[%s3730_s1 + $0x6b0] sm:$0xff] }
  0x7f   :  { %826 = vmatmul.mubr.f32.gmra.mxu1 %v138_v56  ;;  %1920 = vmatpush3.msra.mxu0 %v277_v57  ;;  %v379_v56 = vld [vmem:[%s3730_s1 + $0x738] sm:$0xff]  ;;  %v109_v57 = vld [vmem:[%s3731_s0 + $0x2c8] sm:$0xff] }
  0x80   :  { %1975 = vmatprep.subr.mxu1 %v325_v58  ;;  %1921 = vmatprep.subr.mxu0 %v292_v59  ;;  %v346_v58 = vld [vmem:[%s3730_s1 + $0x630] sm:$0xff] }
  0x81   :  { %1976 = vmatpush3.msra.mxu1 %v309_v60  ;;  %1922 = vmatpush3.msra.mxu0 %v276_v61  ;;  %v394_v59 = vld [vmem:[%s3730_s1 + $0x7b0] sm:$0xff]  ;;  %v108_v60 = vld [vmem:[%s3731_s0 + $0x2c0] sm:$0xff]  ;;  %v111_v61 = vld [vmem:[%s3731_s0 + $0x2d8] sm:$0xff] }
  0x82   :  { %895 = vmatprep.mubr.f32.mxu0 %v29_v62  ;;  %1977 = vmatprep.subr.mxu1 %v324_v63  ;;  %v361_v62 = vld [vmem:[%s3730_s1 + $0x6a8] sm:$0xff]  ;;  %v378_v63 = vld [vmem:[%s3730_s1 + $0x730] sm:$0xff] }
  0x83   :  { %896 = vmatmul.mubr.f32.vlgmr.msra.gmra.mxu0 %v28_v0  ;;  %1978 = vmatpush3.msra.mxu1 %v308_v1  ;;  %v110_v0 = vld [vmem:[%s3731_s0 + $0x2d0] sm:$0xff]  ;;  %v345_v1 = vld [vmem:[%s3730_s1 + $0x628] sm:$0xff] }
  0x84   :  { %1000 = vmatprep.mubr.f32.mxu1 %v31_v2  ;;  %2003 = vmatprep.subr.mxu0 %v371_v3  ;;  %v393_v2 = vld [vmem:[%s3730_s1 + $0x7a8] sm:$0xff]  ;;  %v360_v3 = vld [vmem:[%s3730_s1 + $0x6a0] sm:$0xff] }
  0x85   :  { %1001 = vmatmul.mubr.f32.vlgmr.msra.gmra.mxu1 %v30_v4  ;;  %2004 = vmatpush3.msra.mxu0 %v355_v5  ;;  %v377_v4 = vld [vmem:[%s3730_s1 + $0x728] sm:$0xff] }
  0x86   :  { %2059 = vmatprep.subr.mxu1 %v403_v6  ;;  %2005 = vmatprep.subr.mxu0 %v370_v7  ;;  %v125_v5 = vld [vmem:[%s3731_s0 + $0x348] sm:$0xff]  ;;  %v344_v6 = vld [vmem:[%s3730_s1 + $0x620] sm:$0xff] }
  0x87   :  { %2060 = vmatpush3.msra.mxu1 %v387_v8  ;;  %900 = vmatprep.mubr.f32.mxu0 %v45_v9  ;;  %v392_v7 = vld [vmem:[%s3730_s1 + $0x7a0] sm:$0xff]  ;;  %v127_v9 = vld [vmem:[%s3731_s0 + $0x358] sm:$0xff] }
  0x88   :  { %2006 = vmatpush3.msra.mxu0 %v354_v10  ;;  %2061 = vmatprep.subr.mxu1 %v402_v11  ;;  %v124_v8 = vld [vmem:[%s3731_s0 + $0x340] sm:$0xff]  ;;  %v359_v10 = vld [vmem:[%s3730_s1 + $0x698] sm:$0xff] }
  0x89   :  { %901 = vmatmul.mubr.f32.gmra.mxu0 %v44_v12  ;;  %1005 = vmatprep.mubr.f32.mxu1 %v47_v13  ;;  %v376_v11 = vld [vmem:[%s3730_s1 + $0x720] sm:$0xff]  ;;  %v126_v12 = vld [vmem:[%s3731_s0 + $0x350] sm:$0xff]  ;;  %v343_v13 = vld [vmem:[%s3730_s1 + $0x618] sm:$0xff] }
  0x8a   :  { %2007 = vmatprep.subr.mxu0 %v369_v14  ;;  %2062 = vmatpush3.msra.mxu1 %v386_v15  ;;  %v391_v14 = vld [vmem:[%s3730_s1 + $0x798] sm:$0xff]  ;;  %v358_v15 = vld [vmem:[%s3730_s1 + $0x690] sm:$0xff] }
  0x8b   :  { %1006 = vmatmul.mubr.f32.gmra.mxu1 %v46_v16  ;;  %2008 = vmatpush3.msra.mxu0 %v353_v17  ;;  %v375_v16 = vld [vmem:[%s3730_s1 + $0x718] sm:$0xff]  ;;  %v141_v17 = vld [vmem:[%s3731_s0 + $0x3c8] sm:$0xff] }
  0x8c   :  { %2063 = vmatprep.subr.mxu1 %v401_v18  ;;  %2009 = vmatprep.subr.mxu0 %v368_v19  ;;  %v342_v18 = vld [vmem:[%s3730_s1 + $0x610] sm:$0xff] }
  0x8d   :  { %2064 = vmatpush3.msra.mxu1 %v385_v20  ;;  %905 = vmatprep.mubr.f32.mxu0 %v61_v21  ;;  %v390_v19 = vld [vmem:[%s3730_s1 + $0x790] sm:$0xff]  ;;  %v140_v20 = vld [vmem:[%s3731_s0 + $0x3c0] sm:$0xff]  ;;  %v143_v21 = vld [vmem:[%s3731_s0 + $0x3d8] sm:$0xff] }
  0x8e   :  { %2010 = vmatpush3.msra.mxu0 %v352_v22  ;;  %2065 = vmatprep.subr.mxu1 %v400_v23  ;;  %v357_v22 = vld [vmem:[%s3730_s1 + $0x688] sm:$0xff]  ;;  %v374_v23 = vld [vmem:[%s3730_s1 + $0x710] sm:$0xff] }
  0x8f   :  { %906 = vmatmul.mubr.f32.gmra.mxu0 %v60_v24  ;;  %1010 = vmatprep.mubr.f32.mxu1 %v63_v25  ;;  %v142_v24 = vld [vmem:[%s3731_s0 + $0x3d0] sm:$0xff]  ;;  %v341_v25 = vld [vmem:[%s3730_s1 + $0x608] sm:$0xff] }
  0x90   :  { %2011 = vmatprep.subr.mxu0 %v367_v26  ;;  %2066 = vmatpush3.msra.mxu1 %v384_v27  ;;  %v389_v26 = vld [vmem:[%s3730_s1 + $0x788] sm:$0xff]  ;;  %v356_v27 = vld [vmem:[%s3730_s1 + $0x680] sm:$0xff] }
  0x91   :  { %1011 = vmatmul.mubr.f32.gmra.mxu1 %v62_v28  ;;  %2012 = vmatpush3.msra.mxu0 %v351_v29  ;;  %v373_v28 = vld [vmem:[%s3730_s1 + $0x708] sm:$0xff]  ;;  %v340_v29 = vld [vmem:[%s3730_s1 + $0x600] sm:$0xff] }
  0x92   :  { %2067 = vmatprep.subr.mxu1 %v399_v30  ;;  %2013 = vmatprep.subr.mxu0 %v366_v31  ;;  %v33_v30 = vld [vmem:[%s3731_s0 + $0x68] sm:$0xff]  ;;  %v388_v31 = vld [vmem:[%s3730_s1 + $0x780] sm:$0xff] }
  0x93   :  { %2068 = vmatpush3.msra.mxu1 %v383_v32  ;;  %910 = vmatprep.mubr.f32.mxu0 %v77_v33  ;;  %v32_v32 = vld [vmem:[%s3731_s0 + $0x60] sm:$0xff] }
  0x94   :  { %2014 = vmatpush3.msra.mxu0 %v350_v34  ;;  %2069 = vmatprep.subr.mxu1 %v398_v35  ;;  %v372_v33 = vld [vmem:[%s3730_s1 + $0x700] sm:$0xff]  ;;  %v35_v34 = vld [vmem:[%s3731_s0 + $0x78] sm:$0xff]  ;;  %v49_v35 = vld [vmem:[%s3731_s0 + $0xe8] sm:$0xff] }
  0x95   :  { %911 = vmatmul.mubr.f32.gmra.mxu0 %v76_v36  ;;  %1015 = vmatprep.mubr.f32.mxu1 %v79_v37  ;;  %v34_v36 = vld [vmem:[%s3731_s0 + $0x70] sm:$0xff]  ;;  %v51_v37 = vld [vmem:[%s3731_s0 + $0xf8] sm:$0xff] }
  0x96   :  { %2015 = vmatprep.subr.mxu0 %v365_v38  ;;  %2070 = vmatpush3.msra.mxu1 %v382_v39  ;;  %v48_v38 = vld [vmem:[%s3731_s0 + $0xe0] sm:$0xff]  ;;  %v65_v39 = vld [vmem:[%s3731_s0 + $0x168] sm:$0xff] }
  0x97   :  { %1016 = vmatmul.mubr.f32.gmra.mxu1 %v78_v40  ;;  %2016 = vmatpush3.msra.mxu0 %v349_v41  ;;  %v50_v40 = vld [vmem:[%s3731_s0 + $0xf0] sm:$0xff]  ;;  %v67_v41 = vld [vmem:[%s3731_s0 + $0x178] sm:$0xff] }
  0x98   :  { %2071 = vmatprep.subr.mxu1 %v397_v42  ;;  %2017 = vmatprep.subr.mxu0 %v364_v43  ;;  %v64_v42 = vld [vmem:[%s3731_s0 + $0x160] sm:$0xff]  ;;  %v81_v43 = vld [vmem:[%s3731_s0 + $0x1e8] sm:$0xff] }
  0x99   :  { %2072 = vmatpush3.msra.mxu1 %v381_v44  ;;  %915 = vmatprep.mubr.f32.mxu0 %v93_v45  ;;  %v66_v44 = vld [vmem:[%s3731_s0 + $0x170] sm:$0xff]  ;;  %v83_v45 = vld [vmem:[%s3731_s0 + $0x1f8] sm:$0xff] }
  0x9a   :  { %2018 = vmatpush3.msra.mxu0 %v348_v46  ;;  %2073 = vmatprep.subr.mxu1 %v396_v47  ;;  %v80_v46 = vld [vmem:[%s3731_s0 + $0x1e0] sm:$0xff]  ;;  %v97_v47 = vld [vmem:[%s3731_s0 + $0x268] sm:$0xff] }
  0x9b   :  { %916 = vmatmul.mubr.f32.gmra.mxu0 %v92_v48  ;;  %1020 = vmatprep.mubr.f32.mxu1 %v95_v49  ;;  %v82_v48 = vld [vmem:[%s3731_s0 + $0x1f0] sm:$0xff]  ;;  %v99_v49 = vld [vmem:[%s3731_s0 + $0x278] sm:$0xff] }
  0x9c   :  { %2019 = vmatprep.subr.mxu0 %v363_v50  ;;  %2074 = vmatpush3.msra.mxu1 %v380_v51  ;;  %v96_v50 = vld [vmem:[%s3731_s0 + $0x260] sm:$0xff]  ;;  %v113_v51 = vld [vmem:[%s3731_s0 + $0x2e8] sm:$0xff] }
  0x9d   :  { %1021 = vmatmul.mubr.f32.gmra.mxu1 %v94_v52  ;;  %2020 = vmatpush3.msra.mxu0 %v347_v53  ;;  %v98_v52 = vld [vmem:[%s3731_s0 + $0x270] sm:$0xff]  ;;  %v115_v53 = vld [vmem:[%s3731_s0 + $0x2f8] sm:$0xff] }
  0x9e   :  { %2075 = vmatprep.subr.mxu1 %v395_v54  ;;  %2021 = vmatprep.subr.mxu0 %v362_v55  ;;  %v112_v54 = vld [vmem:[%s3731_s0 + $0x2e0] sm:$0xff]  ;;  %v129_v55 = vld [vmem:[%s3731_s0 + $0x368] sm:$0xff] }
  0x9f   :  { %2076 = vmatpush3.msra.mxu1 %v379_v56  ;;  %920 = vmatprep.mubr.f32.mxu0 %v109_v57  ;;  %v114_v56 = vld [vmem:[%s3731_s0 + $0x2f0] sm:$0xff]  ;;  %v131_v57 = vld [vmem:[%s3731_s0 + $0x378] sm:$0xff] }
  0xa0   :  { %2022 = vmatpush3.msra.mxu0 %v346_v58  ;;  %2077 = vmatprep.subr.mxu1 %v394_v59  ;;  %v128_v58 = vld [vmem:[%s3731_s0 + $0x360] sm:$0xff]  ;;  %v145_v59 = vld [vmem:[%s3731_s0 + $0x3e8] sm:$0xff] }
  0xa1   :  { %921 = vmatmul.mubr.f32.gmra.mxu0 %v108_v60  ;;  %1025 = vmatprep.mubr.f32.mxu1 %v111_v61  ;;  %v130_v60 = vld [vmem:[%s3731_s0 + $0x370] sm:$0xff]  ;;  %v147_v61 = vld [vmem:[%s3731_s0 + $0x3f8] sm:$0xff] }
  0xa2   :  { %2023 = vmatprep.subr.mxu0 %v361_v62  ;;  %2078 = vmatpush3.msra.mxu1 %v378_v63  ;;  %v144_v62 = vld [vmem:[%s3731_s0 + $0x3e0] sm:$0xff]  ;;  %v146_v63 = vld [vmem:[%s3731_s0 + $0x3f0] sm:$0xff] }
  0xa3   :  { %1026 = vmatmul.mubr.f32.gmra.mxu1 %v110_v0  ;;  %2024 = vmatpush3.msra.mxu0 %v345_v1 }
  0xa4   :  { %2079 = vmatprep.subr.mxu1 %v393_v2  ;;  %2025 = vmatprep.subr.mxu0 %v360_v3  ;;  %v3400_v2 = vld [vmem:[%s3732_s2] ss:$0 sm:$0xff] }
  0xa5   :  { %2080 = vmatpush3.msra.mxu1 %v377_v4  ;;  %925 = vmatprep.mubr.f32.mxu0 %v125_v5 }
  0xa6   :  { %2026 = vmatpush3.msra.mxu0 %v344_v6  ;;  %2081 = vmatprep.subr.mxu1 %v392_v7 }
  0xa7   :  { %926 = vmatmul.mubr.f32.gmra.mxu0 %v124_v8  ;;  %1030 = vmatprep.mubr.f32.mxu1 %v127_v9  ;;  %v1258_v9 = vld [vmem:[%s3733_s3 + $0x38] sm:$0xff] }
  0xa8   :  { %2027 = vmatprep.subr.mxu0 %v359_v10  ;;  %2082 = vmatpush3.msra.mxu1 %v376_v11 }
  0xa9   :  { %1031 = vmatmul.mubr.f32.gmra.mxu1 %v126_v12  ;;  %2028 = vmatpush3.msra.mxu0 %v343_v13 }
  0xaa   :  { %2083 = vmatprep.subr.mxu1 %v391_v14  ;;  %2029 = vmatprep.subr.mxu0 %v358_v15 }
  0xab   :  { %2084 = vmatpush3.msra.mxu1 %v375_v16  ;;  %930 = vmatprep.mubr.f32.mxu0 %v141_v17  ;;  %v1257_v17 = vld [vmem:[%s3733_s3 + $0x30] sm:$0xff] }
  0xac   :  { %2030 = vmatpush3.msra.mxu0 %v342_v18  ;;  %2085 = vmatprep.subr.mxu1 %v390_v19 }
  0xad   :  { %931 = vmatmul.mubr.f32.gmra.mxu0 %v140_v20  ;;  %1035 = vmatprep.mubr.f32.mxu1 %v143_v21 }
  0xae   :  { %2031 = vmatprep.subr.mxu0 %v357_v22  ;;  %2086 = vmatpush3.msra.mxu1 %v374_v23 }
  0xaf   :  { %1036 = vmatmul.mubr.f32.gmra.mxu1 %v142_v24  ;;  %2032 = vmatpush3.msra.mxu0 %v341_v25 }
  0xb0   :  { %2087 = vmatprep.subr.mxu1 %v389_v26  ;;  %2033 = vmatprep.subr.mxu0 %v356_v27  ;;  %v1256_v26 = vld [vmem:[%s3733_s3 + $0x28] sm:$0xff] }
  0xb1   :  { %2088 = vmatpush3.msra.mxu1 %v373_v28  ;;  %2034 = vmatpush3.msra.mxu0 %v340_v29 }
  0xb2   :  { %1105 = vmatprep.mubr.f32.mxu0 %v33_v30  ;;  %2089 = vmatprep.subr.mxu1 %v388_v31  ;;  %v1255_v31 = vld [vmem:[%s3733_s3 + $0x20] sm:$0xff] }
  0xb3   :  { %1106 = vmatmul.mubr.f32.vlgmr.msra.gmra.mxu0 %v32_v32  ;;  %2090 = vmatpush3.msra.mxu1 %v372_v33 }
  0xb4   :  { %1210 = vmatprep.mubr.f32.mxu1 %v35_v34  ;;  %1110 = vmatprep.mubr.f32.mxu0 %v49_v35  ;;  %v1254_v34 = vld [vmem:[%s3733_s3 + $0x18] sm:$0xff] }
  0xb5   :  { %1211 = vmatmul.mubr.f32.vlgmr.msra.gmra.mxu1 %v34_v36  ;;  %2131 = vmatprep.subr.mxu0 %v1258_v9 }
  0xb6   :  { %1215 = vmatprep.mubr.f32.mxu1 %v51_v37  ;;  %2159 = vmatprep.subr.mxu1 %v1258_v9 }
  0xb7   :  { %1111 = vmatmul.mubr.f32.gmra.mxu0 %v48_v38  ;;  %2167 = vmatpush3.msra.mxu1 %v1258_v9  ;;  %v1253_v38 = vld [vmem:[%s3733_s3 + $0x10] sm:$0xff] }
  0xb8   :  { %1115 = vmatprep.mubr.f32.mxu0 %v65_v39  ;;  %2132 = vmatpush3.msra.mxu0 %v1258_v9 }
  0xb9   :  { %1216 = vmatmul.mubr.f32.gmra.mxu1 %v50_v40  ;;  %2133 = vmatprep.subr.mxu0 %v1257_v17 }
  0xba   :  { %1220 = vmatprep.mubr.f32.mxu1 %v67_v41  ;;  %2160 = vmatprep.subr.mxu1 %v1257_v17 }
  0xbb   :  { %1116 = vmatmul.mubr.f32.gmra.mxu0 %v64_v42  ;;  %2168 = vmatpush3.msra.mxu1 %v1257_v17  ;;  %v1252_v42 = vld [vmem:[%s3733_s3 + $0x8] sm:$0xff] }
  0xbc   :  { %1120 = vmatprep.mubr.f32.mxu0 %v81_v43  ;;  %2134 = vmatpush3.msra.mxu0 %v1257_v17 }
  0xbd   :  { %1221 = vmatmul.mubr.f32.gmra.mxu1 %v66_v44  ;;  %2135 = vmatprep.subr.mxu0 %v1256_v26 }
  0xbe   :  { %1225 = vmatprep.mubr.f32.mxu1 %v83_v45  ;;  %2161 = vmatprep.subr.mxu1 %v1256_v26  ;;  %v1251_v45 = vld [vmem:[%s3733_s3] sm:$0xff] }
  0xbf   :  { %1121 = vmatmul.mubr.f32.gmra.mxu0 %v80_v46  ;;  %2169 = vmatpush3.msra.mxu1 %v1256_v26 }
  0xc0   :  { %1125 = vmatprep.mubr.f32.mxu0 %v97_v47  ;;  %2136 = vmatpush3.msra.mxu0 %v1256_v26 }
  0xc1   :  { %1226 = vmatmul.mubr.f32.gmra.mxu1 %v82_v48  ;;  %2137 = vmatprep.subr.mxu0 %v1255_v31 }
  0xc2   :  { %1230 = vmatprep.mubr.f32.mxu1 %v99_v49  ;;  %2162 = vmatprep.subr.mxu1 %v1255_v31 }
  0xc3   :  { %1126 = vmatmul.mubr.f32.gmra.mxu0 %v96_v50  ;;  %2170 = vmatpush3.msra.mxu1 %v1255_v31 }
  0xc4   :  { %1130 = vmatprep.mubr.f32.mxu0 %v113_v51  ;;  %2138 = vmatpush3.msra.mxu0 %v1255_v31 }
  0xc5   :  { %1231 = vmatmul.mubr.f32.gmra.mxu1 %v98_v52  ;;  %2139 = vmatprep.subr.mxu0 %v1254_v34 }
  0xc6   :  { %1235 = vmatprep.mubr.f32.mxu1 %v115_v53  ;;  %2163 = vmatprep.subr.mxu1 %v1254_v34 }
  0xc7   :  { %1131 = vmatmul.mubr.f32.gmra.mxu0 %v112_v54  ;;  %2171 = vmatpush3.msra.mxu1 %v1254_v34 }
  0xc8   :  { %1135 = vmatprep.mubr.f32.mxu0 %v129_v55  ;;  %2140 = vmatpush3.msra.mxu0 %v1254_v34 }
  0xc9   :  { %1236 = vmatmul.mubr.f32.gmra.mxu1 %v114_v56  ;;  %2141 = vmatprep.subr.mxu0 %v1253_v38 }
  0xca   :  { %1240 = vmatprep.mubr.f32.mxu1 %v131_v57  ;;  %2164 = vmatprep.subr.mxu1 %v1253_v38 }
  0xcb   :  { %1136 = vmatmul.mubr.f32.gmra.mxu0 %v128_v58  ;;  %2172 = vmatpush3.msra.mxu1 %v1253_v38 }
  0xcc   :  { %1140 = vmatprep.mubr.f32.mxu0 %v145_v59  ;;  %2142 = vmatpush3.msra.mxu0 %v1253_v38 }
  0xcd   :  { %1241 = vmatmul.mubr.f32.gmra.mxu1 %v130_v60  ;;  %2143 = vmatprep.subr.mxu0 %v1252_v42 }
  0xce   :  { %1245 = vmatprep.mubr.f32.mxu1 %v147_v61  ;;  %2165 = vmatprep.subr.mxu1 %v1252_v42 }
  0xcf   :  { %1141 = vmatmul.mubr.f32.gmra.mxu0 %v144_v62  ;;  %2173 = vmatpush3.msra.mxu1 %v1252_v42 }
  0xd0   :  { %2144 = vmatpush3.msra.mxu0 %v1252_v42  ;;  %2166 = vmatprep.subr.mxu1 %v1251_v45 }
  0xd1   :  { %1246 = vmatmul.mubr.f32.gmra.mxu1 %v146_v63  ;;  %2145 = vmatprep.subr.mxu0 %v1251_v45 }
  0xd2   :  { %2146 = vmatpush3.msra.mxu0 %v1251_v45  ;;  %2174 = vmatpush3.msra.mxu1 %v1251_v45 }
  0xe3   :  { %v1699_v0 = vpop.f32.mrf.mxu0 }
  0xe5   :  { %v1755_v1 = vpop.f32.mrf.mxu1  ;;  %v1700_v3 = vpop.f32.mrf.mxu0 }
  0xe6   :  { %v1701_v4 = vadd.f32 %v1700_v3, %v1699_v0 }
  0xe7   :  { %v1756_v5 = vpop.f32.mrf.mxu1 }
  0xe8   :  { %v478_v6 = vadd.f32 %v1701_v4, %v3400_v2  ;;  %v1757_v7 = vadd.f32 %v1756_v5, %v1755_v1 }
  0xe9   :  { %v1702_v8 = vpop.f32.mrf.mxu0 }
  0xea   :  { %v3406_v10 = vadd.f32 %v1757_v7, %v478_v6 }
  0xeb   :  { %v1758_v11 = vpop.f32.mrf.mxu1  ;;  %v1703_v12 = vpop.f32.mrf.mxu0 }
  0xec   :  { %v1704_v13 = vadd.f32 %v1703_v12, %v1702_v8 }
  0xed   :  { %v1759_v14 = vpop.f32.mrf.mxu1 }
  0xee   :  { %v483_v15 = vadd.f32 %v1704_v13, %v3400_v2  ;;  %v1760_v16 = vadd.f32 %v1759_v14, %v1758_v11 }
  0xef   :  { %v1705_v18 = vpop.f32.mrf.mxu0 }
  0xf0   :  { %v3412_v19 = vadd.f32 %v1760_v16, %v483_v15 }
  0xf1   :  { %v1761_v20 = vpop.f32.mrf.mxu1  ;;  %v1706_v21 = vpop.f32.mrf.mxu0 }
  0xf2   :  { %v1707_v22 = vadd.f32 %v1706_v21, %v1705_v18 }
  0xf3   :  { %v1762_v23 = vpop.f32.mrf.mxu1 }
  0xf4   :  { %v488_v24 = vadd.f32 %v1707_v22, %v3400_v2  ;;  %v1763_v25 = vadd.f32 %v1762_v23, %v1761_v20 }
  0xf5   :  { %v1708_v27 = vpop.f32.mrf.mxu0 }
  0xf6   :  { %v3418_v28 = vadd.f32 %v1763_v25, %v488_v24 }
  0xf7   :  { %v1764_v29 = vpop.f32.mrf.mxu1  ;;  %v1709_v30 = vpop.f32.mrf.mxu0 }
  0xf8   :  { %v1710_v32 = vadd.f32 %v1709_v30, %v1708_v27 }
  0xf9   :  { %v1765_v33 = vpop.f32.mrf.mxu1 }
  0xfa   :  { %v493_v35 = vadd.f32 %v1710_v32, %v3400_v2  ;;  %v1766_v36 = vadd.f32 %v1765_v33, %v1764_v29 }
  0xfb   :  { %v1711_v37 = vpop.f32.mrf.mxu0 }
  0xfc   :  { %v3430_v39 = vadd.f32 %v1766_v36, %v493_v35 }
  0xfd   :  { %v1767_v40 = vpop.f32.mrf.mxu1  ;;  %v1712_v41 = vpop.f32.mrf.mxu0 }
  0xfe   :  { %v1713_v43 = vadd.f32 %v1712_v41, %v1711_v37 }
  0xff   :  { %v1768_v44 = vpop.f32.mrf.mxu1 }
 0x100   :  { %v498_v46 = vadd.f32 %v1713_v43, %v3400_v2  ;;  %v1769_v47 = vadd.f32 %v1768_v44, %v1767_v40 }
 0x101   :  { %v1714_v48 = vpop.f32.mrf.mxu0 }
 0x102   :  { %v3439_v49 = vadd.f32 %v1769_v47, %v498_v46 }
 0x103   :  { %v1770_v50 = vpop.f32.mrf.mxu1  ;;  %v1715_v51 = vpop.f32.mrf.mxu0 }
 0x104   :  { %v1716_v52 = vadd.f32 %v1715_v51, %v1714_v48 }
 0x105   :  { %v1771_v53 = vpop.f32.mrf.mxu1 }
 0x106   :  { %v503_v54 = vadd.f32 %v1716_v52, %v3400_v2  ;;  %v1772_v55 = vadd.f32 %v1771_v53, %v1770_v50 }
 0x107   :  { %v1717_v56 = vpop.f32.mrf.mxu0 }
 0x108   :  { %v3442_v57 = vadd.f32 %v1772_v55, %v503_v54 }
 0x109   :  { %v1773_v58 = vpop.f32.mrf.mxu1  ;;  %v1718_v59 = vpop.f32.mrf.mxu0 }
 0x10a   :  { %v1719_v60 = vadd.f32 %v1718_v59, %v1717_v56 }
 0x10b   :  { %v1774_v61 = vpop.f32.mrf.mxu1 }
 0x10c   :  { %v508_v62 = vadd.f32 %v1719_v60, %v3400_v2  ;;  %v1775_v63 = vadd.f32 %v1774_v61, %v1773_v58 }
 0x10d   :  { %v1720_v0 = vpop.f32.mrf.mxu0 }
 0x10e   :  { %v3445_v1 = vadd.f32 %v1775_v63, %v508_v62 }
 0x10f   :  { %v1776_v3 = vpop.f32.mrf.mxu1  ;;  %v1721_v4 = vpop.f32.mrf.mxu0 }
 0x110   :  { %3736 = vst [vmem:[#allocation2_spill] sm:$0xff] %v3445_v1  ;;  %v1722_v5 = vadd.f32 %v1721_v4, %v1720_v0 }
 0x111   :  { %v1777_v6 = vpop.f32.mrf.mxu1 }
 0x112   :  { %v513_v7 = vadd.f32 %v1722_v5, %v3400_v2  ;;  %v1778_v8 = vadd.f32 %v1777_v6, %v1776_v3 }
 0x113   :  { %v1811_v9 = vpop.f32.mrf.mxu0 }
 0x114   :  { %v3448_v11 = vadd.f32 %v1778_v8, %v513_v7 }
 0x115   :  { %v3450_v12 = vpop.f32.mrf.mxu1  ;;  %v1812_v13 = vpop.f32.mrf.mxu0 }
 0x116   :  { %3737 = vst [vmem:[#allocation3_spill] sm:$0xff] %v3448_v11 }
 0x117   :  { %v1868_v14 = vpop.f32.mrf.mxu1 }
 0x119   :  { %v1814_v15 = vpop.f32.mrf.mxu0 }
 0x11b   :  { %v3452_v16 = vpop.f32.mrf.mxu1  ;;  %v1815_v17 = vpop.f32.mrf.mxu0 }
 0x11d   :  { %v3454_v18 = vpop.f32.mrf.mxu1 }
 0x11f   :  { %v1817_v20 = vpop.f32.mrf.mxu0 }
 0x121   :  { %v3456_v21 = vpop.f32.mrf.mxu1  ;;  %v1818_v22 = vpop.f32.mrf.mxu0 }
 0x122   :  { %v1819_v1 = vadd.f32 %v1818_v22, %v1817_v20 }
 0x123   :  { %v3458_v23 = vpop.f32.mrf.mxu1 }
 0x125   :  { %v3460_v2 = vpop.f32.mrf.mxu0 }
 0x127   :  { %v3462_v24 = vpop.f32.mrf.mxu1  ;;  %v1821_v25 = vpop.f32.mrf.mxu0 }
 0x129   :  { %v3464_v26 = vpop.f32.mrf.mxu1 }
 0x12b   :  { %v3466_v27 = vpop.f32.mrf.mxu0 }
 0x12d   :  { %v3468_v29 = vpop.f32.mrf.mxu1  ;;  %v3470_v30 = vpop.f32.mrf.mxu0 }
 0x12f   :  { %v3472_v31 = vpop.f32.mrf.mxu1 }
 0x131   :  { %v3474_v32 = vpop.f32.mrf.mxu0 }
 0x133   :  { %v3476_v33 = vpop.f32.mrf.mxu1  ;;  %v3478_v34 = vpop.f32.mrf.mxu0 }
 0x135   :  { %v3480_v35 = vpop.f32.mrf.mxu1 }
 0x137   :  { %v3482_v36 = vpop.f32.mrf.mxu0 }
 0x139   :  { %v3484_v37 = vpop.f32.mrf.mxu1  ;;  %v3486_v38 = vpop.f32.mrf.mxu0 }
 0x13a   :  { %3738 = vst [vmem:[#allocation4_spill] sm:$0xff] %v3484_v37 }
 0x13b   :  { %v3488_v40 = vpop.f32.mrf.mxu1 }
 0x13c   :  { %3739 = vst [vmem:[#allocation5_spill] sm:$0xff] %v3488_v40 }
 0x13d   :  { %v3490_v41 = vpop.f32.mrf.mxu0 }
 0x13e   :  { %3740 = vst [vmem:[#allocation6_spill] sm:$0xff] %v3490_v41 }
 0x13f   :  { %v3492_v42 = vpop.f32.mrf.mxu1  ;;  %v3494_v43 = vpop.f32.mrf.mxu0 }
 0x140   :  { %3741 = vst [vmem:[#allocation7_spill] sm:$0xff] %v3492_v42  ;;  %3742 = vst [vmem:[#allocation8_spill] sm:$0xff] %v3494_v43  ;;  %v1813_v42 = vadd.f32 %v1812_v13, %v1811_v9 }
 0x141   :  { %v3496_v44 = vpop.f32.mrf.mxu1 }
 0x142   :  { %3743 = vst [vmem:[#allocation9_spill] sm:$0xff] %v3496_v44 }
 0x143   :  { %v1923_v45 = vpop.f32.mrf.mxu0 }
 0x145   :  { %v1979_v46 = vpop.f32.mrf.mxu1  ;;  %v1924_v47 = vpop.f32.mrf.mxu0 }
 0x146   :  { %v1925_v41 = vadd.f32 %v1924_v47, %v1923_v45 }
 0x147   :  { %v1980_v48 = vpop.f32.mrf.mxu1 }
 0x148   :  { %v1981_v22 = vadd.f32 %v1980_v48, %v1979_v46 }
 0x149   :  { %v1926_v50 = vpop.f32.mrf.mxu0 }
 0x14b   :  { %v1982_v51 = vpop.f32.mrf.mxu1  ;;  %v1927_v52 = vpop.f32.mrf.mxu0 }
 0x14d   :  { %v1983_v53 = vpop.f32.mrf.mxu1 }
 0x14f   :  { %v1929_v54 = vpop.f32.mrf.mxu0 }
 0x151   :  { %v3498_v55 = vpop.f32.mrf.mxu1  ;;  %v1930_v56 = vpop.f32.mrf.mxu0 }
 0x152   :  { %v1931_v45 = vadd.f32 %v1930_v56, %v1929_v54 }
 0x153   :  { %v1986_v58 = vpop.f32.mrf.mxu1 }
 0x154   :  { %v1987_v56 = vadd.f32 %v1986_v58, %v3498_v55 }
 0x155   :  { %v1932_v59 = vpop.f32.mrf.mxu0 }
 0x157   :  { %v3500_v60 = vpop.f32.mrf.mxu1  ;;  %v1933_v61 = vpop.f32.mrf.mxu0 }
 0x159   :  { %v3502_v62 = vpop.f32.mrf.mxu1 }
 0x15b   :  { %v3504_v63 = vpop.f32.mrf.mxu0 }
 0x15d   :  { %v3506_v0 = vpop.f32.mrf.mxu1  ;;  %v3508_v3 = vpop.f32.mrf.mxu0 }
 0x15e   :  { %3744 = vst [vmem:[#allocation10_spill] sm:$0xff] %v3506_v0  ;;  %v688_v0 = vadd.f32 %v1813_v42, %v3406_v10  ;;  %v1875_v42 = vadd.f32 %v3458_v23, %v3456_v21  ;;  %v1878_v21 = vadd.f32 %v3464_v26, %v3462_v24 }
 0x15f   :  { %v3510_v4 = vpop.f32.mrf.mxu1 }
 0x160   :  { %3745 = vst [vmem:[#allocation11_spill] sm:$0xff] %v3510_v4  ;;  %v1816_v4 = vadd.f32 %v1815_v17, %v1814_v15  ;;  %v1928_v15 = vadd.f32 %v1927_v52, %v1926_v50  ;;  %v698_v17 = vadd.f32 %v1819_v1, %v3418_v28  ;;  %v1825_v28 = vadd.f32 %v3470_v30, %v3466_v27 }
 0x161   :  { %v3512_v5 = vpop.f32.mrf.mxu0  ;;  %v1984_v1 = vadd.f32 %v1983_v53, %v1982_v51  ;;  %v1934_v50 = vadd.f32 %v1933_v61, %v1932_v59 }
 0x162   :  { %v693_v13 = vadd.f32 %v1816_v4, %v3412_v19  ;;  %v708_v53 = vadd.f32 %v1825_v28, %v3439_v49  ;;  %v1831_v49 = vadd.f32 %v3486_v38, %v3482_v36  ;;  %v3759_v28 = vld [vmem:[#allocation5_spill] sm:$0xff] }
 0x163   :  { %v3514_v6 = vpop.f32.mrf.mxu1  ;;  %v3516_v7 = vpop.f32.mrf.mxu0 }
 0x164   :  { %3746 = vst [vmem:[#allocation12_spill] sm:$0xff] %v3514_v6  ;;  %3747 = vst [vmem:[#allocation13_spill] sm:$0xff] %v3516_v7  ;;  %v1869_v6 = vadd.f32 %v1868_v14, %v3450_v12  ;;  %v1822_v12 = vadd.f32 %v1821_v25, %v3460_v2 }
 0x165   :  { %v3518_v8 = vpop.f32.mrf.mxu1 }
 0x166   :  { %3748 = vst [vmem:[#allocation14_spill] sm:$0xff] %v3518_v8  ;;  %v793_v9 = vadd.f32 %v1869_v6, %v688_v0 }
 0x167   :  { %v3520_v44 = vpop.f32.mrf.mxu0 }
 0x168   :  { %v898_v10 = vadd.f32 %v1925_v41, %v793_v9 }
 0x169   :  { %v3522_v11 = vpop.f32.mrf.mxu1  ;;  %v3524_v40 = vpop.f32.mrf.mxu0 }
 0x16a   :  { %3749 = vst [vmem:[#allocation15_spill] sm:$0xff] %v3522_v11  ;;  %v1003_v0 = vadd.f32 %v1981_v22, %v898_v10 }
 0x16b   :  { %v3526_v37 = vpop.f32.mrf.mxu1 }
 0x16c   :  { %3750 = vst [vmem:[#allocation16_spill] sm:$0xff] %v3526_v37  ;;  %v1872_v37 = vadd.f32 %v3454_v18, %v3452_v16  ;;  %v703_v16 = vadd.f32 %v1822_v12, %v3430_v39  ;;  %v1828_v39 = vadd.f32 %v3478_v34, %v3474_v32  ;;  %v1937_v32 = vadd.f32 %v3508_v3, %v3504_v63  ;;  %v3752_v3 = vld [vmem:[#allocation13_spill] sm:$0xff] }
 0x16d   :  { %v3529_v43 = vpop.f32.mrf.mxu0  ;;  %v1884_v63 = vadd.f32 %v3480_v35, %v3476_v33 }
 0x16e   :  { %v798_v20 = vadd.f32 %v1872_v37, %v693_v13  ;;  %v808_v51 = vadd.f32 %v1878_v21, %v703_v16  ;;  %v713_v58 = vadd.f32 %v1828_v39, %v3442_v57  ;;  %v3756_v16 = vld [vmem:[#allocation10_spill] sm:$0xff] }
 0x16f   :  { %v3532_v7 = vpop.f32.mrf.mxu1  ;;  %v3534_v8 = vpop.f32.mrf.mxu0 }
 0x170   :  { %v903_v4 = vadd.f32 %v1928_v15, %v798_v20  ;;  %v913_v13 = vadd.f32 %v1934_v50, %v808_v51  ;;  %v3760_v50 = vld [vmem:[#allocation12_spill] sm:$0xff] }
 0x171   :  { %v3537_v11 = vpop.f32.mrf.mxu1 }
 0x172   :  { %3751 = vst [vmem:[#allocation17_spill] sm:$0xff] %v3537_v11  ;;  %v803_v11 = vadd.f32 %v1875_v42, %v698_v17  ;;  %v1008_v48 = vadd.f32 %v1984_v1, %v903_v4  ;;  %v3755_v4 = vld [vmem:[#allocation8_spill] sm:$0xff] }
 0x173   :  { %v2035_v14 = vpop.f32.mrf.mxu0 }
 0x174   :  { %v908_v23 = vadd.f32 %v1931_v45, %v803_v11  ;;  %v1881_v11 = vadd.f32 %v3472_v31, %v3468_v29  ;;  %v1990_v29 = vadd.f32 %v3502_v62, %v3500_v60  ;;  %v818_v45 = vadd.f32 %v1884_v63, %v713_v58 }
 0x175   :  { %v2091_v47 = vpop.f32.mrf.mxu1  ;;  %v2036_v19 = vpop.f32.mrf.mxu0 }
 0x176   :  { %v2037_v6 = vadd.f32 %v2036_v19, %v2035_v14  ;;  %v1013_v26 = vadd.f32 %v1987_v56, %v908_v23  ;;  %v813_v17 = vadd.f32 %v1881_v11, %v708_v53  ;;  %v1940_v14 = vadd.f32 %v3752_v3, %v3512_v5  ;;  %v3758_v5 = vld [vmem:[#allocation4_spill] sm:$0xff]  ;;  %v3764_v11 = vld [vmem:[#allocation9_spill] sm:$0xff] }
 0x177   :  { %v2092_v18 = vpop.f32.mrf.mxu1  ;;  %v2038_v41 = vpop.f32.mrf.mxu0  ;;  %v1018_v22 = vadd.f32 %v1990_v29, %v913_v13  ;;  %v1887_v1 = vadd.f32 %v3759_v28, %v3758_v5  ;;  %v1946_v13 = vadd.f32 %v3534_v8, %v3529_v43 }
 0x178   :  { %v1108_v2 = vadd.f32 %v2037_v6, %v1003_v0  ;;  %v2093_v25 = vadd.f32 %v2092_v18, %v2091_v47  ;;  %v918_v36 = vadd.f32 %v1937_v32, %v813_v17  ;;  %v3753_v47 = vld [vmem:[#allocation2_spill] sm:$0xff]  ;;  %v3757_v18 = vld [vmem:[#allocation11_spill] sm:$0xff] }
 0x179   :  { %v2094_v37 = vpop.f32.mrf.mxu1  ;;  %v2039_v46 = vpop.f32.mrf.mxu0  ;;  %v718_v19 = vadd.f32 %v1831_v49, %v3753_v47  ;;  %v3754_v0 = vld [vmem:[#allocation6_spill] sm:$0xff]  ;;  %v1993_v33 = vadd.f32 %v3757_v18, %v3756_v16  ;;  %v3767_v8 = vld [vmem:[#allocation17_spill] sm:$0xff] }
 0x17a   :  { %v1213_v52 = vadd.f32 %v2093_v25, %v1108_v2  ;;  %v2040_v54 = vadd.f32 %v2039_v46, %v2038_v41  ;;  %v1834_v6 = vadd.f32 %v3755_v4, %v3754_v0  ;;  %v923_v2 = vadd.f32 %v1940_v14, %v818_v45 }
 0x17b   :  { %v2095_v27 = vpop.f32.mrf.mxu1  ;;  %v2041_v30 = vpop.f32.mrf.mxu0  ;;  %v1023_v23 = vadd.f32 %v1993_v33, %v918_v36  ;;  %v2002_v36 = vadd.f32 %v3767_v8, %v3532_v7  ;;  %v1658_v7 = vld [vmem:[%s3734_s4] ss:$0 sm:$0xff]  ;;  %s2214_s4 = smov 127  }
 0x17c   :  { %v1113_v9 = vadd.f32 %v2040_v54, %v1008_v48  ;;  %v2096_v24 = vadd.f32 %v2095_v27, %v2094_v37  ;;  %2147 = vmatprep.mubr.msk.f32.mxu0 %vm1266_vm0, %v1213_v52  ;;  %v1943_v37 = vadd.f32 %v3524_v40, %v3520_v44  ;;  %v3761_v52 = vld [vmem:[#allocation14_spill] sm:$0xff]  ;;  %v823_v27 = vadd.f32 %v1887_v1, %v718_v19 }
 0x17d   :  { %v2097_v59 = vpop.f32.mrf.mxu1  ;;  %v2042_v61 = vpop.f32.mrf.mxu0  ;;  %v1996_v54 = vadd.f32 %v3761_v52, %v3760_v50 }
 0x17e   :  { %v1218_v34 = vadd.f32 %v2096_v24, %v1113_v9  ;;  %v2043_v55 = vadd.f32 %v2042_v61, %v2041_v30  ;;  %v3762_v30 = vld [vmem:[#allocation3_spill] sm:$0xff]  ;;  %v928_v44 = vadd.f32 %v1943_v37, %v823_v27 }
 0x17f   :  { %v2098_v10 = vpop.f32.mrf.mxu1  ;;  %v2044_v15 = vpop.f32.mrf.mxu0  ;;  %v723_v51 = vadd.f32 %v1834_v6, %v3762_v30  ;;  %v3763_v24 = vld [vmem:[#allocation7_spill] sm:$0xff] }
 0x180   :  { %v1118_v31 = vadd.f32 %v2043_v55, %v1013_v26  ;;  %v2099_v12 = vadd.f32 %v2098_v10, %v2097_v59  ;;  %2148 = vmatmul.mubr.msk.f32.vlgmr.msra.gmra.mxu0 %vm1266_vm0, %v1218_v34  ;;  %v1890_v26 = vadd.f32 %v3764_v11, %v3763_v24  ;;  %v1028_v59 = vadd.f32 %v1996_v54, %v923_v2  ;;  %v3765_v10 = vld [vmem:[#allocation15_spill] sm:$0xff] }
 0x181   :  { %v2100_v57 = vpop.f32.mrf.mxu1  ;;  %v2045_v20 = vpop.f32.mrf.mxu0 }
 0x182   :  { %v1223_v38 = vadd.f32 %v2099_v12, %v1118_v31  ;;  %v2046_v42 = vadd.f32 %v2045_v20, %v2044_v15  ;;  %v828_v49 = vadd.f32 %v1890_v26, %v723_v51  ;;  %v3766_v15 = vld [vmem:[#allocation16_spill] sm:$0xff] }
 0x183   :  { %v2101_v60 = vpop.f32.mrf.mxu1  ;;  %v2047_v62 = vpop.f32.mrf.mxu0  ;;  %v1999_v17 = vadd.f32 %v3766_v15, %v3765_v10 }
 0x184   :  { %v1123_v35 = vadd.f32 %v2046_v42, %v1018_v22  ;;  %v2102_v41 = vadd.f32 %v2101_v60, %v2100_v57  ;;  %2150 = vmatprep.mubr.msk.f32.mxu0 %vm1266_vm0, %v1223_v38  ;;  %v933_v14 = vadd.f32 %v1946_v13, %v828_v49 }
 0x185   :  { %v2103_v25 = vpop.f32.mrf.mxu1  ;;  %v2048_v21 = vpop.f32.mrf.mxu0  ;;  %v1033_v3 = vadd.f32 %v1999_v17, %v928_v44 }
 0x186   :  { %v1228_v46 = vadd.f32 %v2102_v41, %v1123_v35  ;;  %v2049_v48 = vadd.f32 %v2048_v21, %v2047_v62  ;;  %v1038_v19 = vadd.f32 %v2002_v36, %v933_v14 }
 0x187   :  { %v2104_v39 = vpop.f32.mrf.mxu1  ;;  %v2050_v56 = vpop.f32.mrf.mxu0 }
 0x188   :  { %v1128_v53 = vadd.f32 %v2049_v48, %v1023_v23  ;;  %v2105_v9 = vadd.f32 %v2104_v39, %v2103_v25  ;;  %2151 = vmatmul.mubr.msk.f32.gmra.mxu0 %vm1266_vm0, %v1228_v46 }
 0x189   :  { %v2106_v61 = vpop.f32.mrf.mxu1  ;;  %v2051_v40 = vpop.f32.mrf.mxu0 }
 0x18a   :  { %v1233_v32 = vadd.f32 %v2105_v9, %v1128_v53  ;;  %v2052_v34 = vadd.f32 %v2051_v40, %v2050_v56 }
 0x18b   :  { %v2107_v55 = vpop.f32.mrf.mxu1  ;;  %v2053_v58 = vpop.f32.mrf.mxu0 }
 0x18c   :  { %v1133_v29 = vadd.f32 %v2052_v34, %v1028_v59  ;;  %v2108_v31 = vadd.f32 %v2107_v55, %v2106_v61  ;;  %2153 = vmatprep.mubr.msk.f32.mxu1 %vm1266_vm0, %v1233_v32 }
 0x18d   :  { %v2109_v12 = vpop.f32.mrf.mxu1  ;;  %v2054_v63 = vpop.f32.mrf.mxu0 }
 0x18e   :  { %v1238_v57 = vadd.f32 %v2108_v31, %v1133_v29  ;;  %v2055_v20 = vadd.f32 %v2054_v63, %v2053_v58 }
 0x18f   :  { %v2110_v22 = vpop.f32.mrf.mxu1  ;;  %v2056_v43 = vpop.f32.mrf.mxu0 }
 0x190   :  { %v1138_v38 = vadd.f32 %v2055_v20, %v1033_v3  ;;  %v2111_v42 = vadd.f32 %v2110_v22, %v2109_v12  ;;  %2154 = vmatmul.mubr.msk.f32.vlgmr.msra.gmra.mxu1 %vm1266_vm0, %v1238_v57 }
 0x191   :  { %v2112_v45 = vpop.f32.mrf.mxu1  ;;  %v2057_v47 = vpop.f32.mrf.mxu0 }
 0x192   :  { %v1243_v60 = vadd.f32 %v2111_v42, %v1138_v38  ;;  %v2058_v62 = vadd.f32 %v2057_v47, %v2056_v43 }
 0x193   :  { %v2113_v0 = vpop.f32.mrf.mxu1 }
 0x194   :  { %v1143_v4 = vadd.f32 %v2058_v62, %v1038_v19  ;;  %v2114_v6 = vadd.f32 %v2113_v0, %v2112_v45  ;;  %2156 = vmatprep.mubr.msk.f32.mxu1 %vm1266_vm0, %v1243_v60 }
 0x196   :  { %v1248_v16 = vadd.f32 %v2114_v6, %v1143_v4 }
 0x198   :  { %2157 = vmatmul.mubr.msk.f32.gmra.mxu1 %vm1266_vm0, %v1248_v16 }
 0x240   :  { %v2149_v18 = vpop.f32.mrf.mxu0 }
 0x241   :  { %v3598_v33 = vadd.f32 %v2149_v18, %v1658_v7 }
 0x242   :  { %v1357_v35 = vpop.f32.mrf.mxu0 }
 0x243   :  { %1406 = vrot.lane.b32.xlu0 %v3598_v33, %s2212_s25  ;;  %v3601_v41 = vadd.f32 %v1658_v7, %v1357_v35 }
 0x247   :  { %1404 = vrot.lane.b32.xlu0 %v3601_v41, %s2212_s25 }
 0x248   :  { %v2152_v5 = vpop.f32.mrf.mxu0 }
 0x249   :  { %v3604_v28 = vadd.f32 %v2152_v5, %v1658_v7 }
 0x24a   :  { %v1367_v1 = vpop.f32.mrf.mxu0 }
 0x24b   :  { %1410 = vrot.lane.b32.xlu1 %v3604_v28, %s2212_s25  ;;  %v3607_v2 = vadd.f32 %v1658_v7, %v1367_v1 }
 0x24f   :  { %1408 = vrot.lane.b32.xlu1 %v3607_v2, %s2212_s25 }
 0x250   :  { %v2155_v25 = vpop.f32.mrf.mxu1 }
 0x251   :  { %v3610_v21 = vadd.f32 %v2155_v25, %v1658_v7 }
 0x252   :  { %v1377_v23 = vpop.f32.mrf.mxu1 }
 0x253   :  { %v3612_v37 = vadd.f32 %v1658_v7, %v1377_v23  ;;  %1414 = vrot.lane.b32.xlu1 %v3610_v21, %s2212_s25 }
 0x255   :  { %1412 = vrot.lane.b32.xlu0 %v3612_v37, %s2212_s25 }
 0x258   :  { %v2158_v46 = vpop.f32.mrf.mxu1 }
 0x259   :  { %v3616_v48 = vadd.f32 %v2158_v46, %v1658_v7 }
 0x25a   :  { %v1387_v50 = vpop.f32.mrf.mxu1 }
 0x25b   :  { %v3618_v52 = vadd.f32 %v1658_v7, %v1387_v50  ;;  %1418 = vrot.lane.b32.xlu1 %v3616_v48, %s2212_s25  ;;  %v2213_v7 = vmov 0  }
 0x25c   :  { %2178 = vset.pattern.permute.xlu1 %v2213_v7  ;;  %2179 = vset.pattern.permute.xlu0 %v2213_v7 }
 0x25d   :  { %1416 = vrot.lane.b32.xlu0 %v3618_v52, %s2212_s25 }
 0x2b5   :  { %v1407_v54 = vpop.permute.xlu0 %1406 }
 0x2b6   :  { %v3623_v39 = vsub.f32 %v3598_v33, %v1407_v54 }
 0x2b8   :  { %v1445_v56 = vand.u32 2147483647, %v3623_v39  ;;  %v1437_v50 = vmax.f32 %v3623_v39, 0.0 }
 0x2b9   :  { %v1405_v27 = vpop.permute.xlu0 %1404 }
 0x2ba   :  { %v1453_v30 = vsub.f32 0.0, %v1445_v56  ;;  %v3627_v51 = vsub.f32 %v3601_v41, %v1405_v27 }
 0x2bc   :  { %v1462_v53 = vmul.f32 1.442695, %v1453_v30  ;;  %v1444_v9 = vand.u32 2147483647, %v3627_v51 }
 0x2bd   :  { %v1411_v24 = vpop.permute.xlu1 %1410 }
 0x2be   :  { %2180 = vpow2.f32 %v1462_v53  ;;  %v1452_v11 = vsub.f32 0.0, %v1444_v9  ;;  %v3631_v26 = vsub.f32 %v3604_v28, %v1411_v24 }
 0x2c0   :  { %v1460_v59 = vmul.f32 1.442695, %v1452_v11  ;;  %v1447_v61 = vand.u32 2147483647, %v3631_v26 }
 0x2c1   :  { %v1409_v40 = vpop.permute.xlu1 %1408 }
 0x2c2   :  { %2182 = vpow2.f32 %v1460_v59  ;;  %v1455_v44 = vsub.f32 0.0, %v1447_v61  ;;  %v3635_v13 = vsub.f32 %v3607_v2, %v1409_v40 }
 0x2c4   :  { %v1466_v32 = vmul.f32 1.442695, %v1455_v44  ;;  %v1446_v34 = vand.u32 2147483647, %v3635_v13 }
 0x2c5   :  { %v1415_v55 = vpop.permute.xlu1 %1414 }
 0x2c6   :  { %2184 = vpow2.f32 %v1466_v32  ;;  %v1454_v58 = vsub.f32 0.0, %v1446_v34  ;;  %v3639_v49 = vsub.f32 %v3610_v21, %v1415_v55  ;;  %v1436_v55 = vmax.f32 %v3627_v51, 0.0 }
 0x2c7   :  { %v1413_v10 = vpop.permute.xlu0 %1412 }
 0x2c8   :  { %v1464_v15 = vmul.f32 1.442695, %v1454_v58  ;;  %v1449_v17 = vand.u32 2147483647, %v3639_v49  ;;  %v3643_v29 = vsub.f32 %v3612_v37, %v1413_v10 }
 0x2ca   :  { %2186 = vpow2.f32 %v1464_v15  ;;  %v1457_v31 = vsub.f32 0.0, %v1449_v17  ;;  %v1448_v12 = vand.u32 2147483647, %v3643_v29 }
 0x2cb   :  { %v2181_v63 = vpop.eup %2180 }
 0x2cc   :  { %v1470_v3 = vmul.f32 1.442695, %v1457_v31  ;;  %v1456_v14 = vsub.f32 0.0, %v1448_v12  ;;  %v1485_v57 = vadd.f32 1.0, %v2181_v63  ;;  %v1488_v6 = vmul.f32 -0.5, %v2181_v63 }
 0x2cd   :  { %v1419_v20 = vpop.permute.xlu1 %1418  ;;  %v1491_v25 = vand.u32 2147483647, %v2181_v63 }
 0x2ce   :  { %2188 = vpow2.f32 %v1470_v3  ;;  %v1468_v22 = vmul.f32 1.442695, %v1456_v14  ;;  %v3647_v43 = vsub.f32 %v3616_v48, %v1419_v20  ;;  %v1489_v5 = vadd.f32 1.0, %v1488_v6 }
 0x2cf   :  { %v2183_v8 = vpop.eup %2182  ;;  %v1417_v36 = vpop.permute.xlu0 %1416  ;;  %2190 = vlog2.f32 %v1485_v57  ;;  %vm1492_vm1 = vcmp.lt.f32.partialorder %v1491_v25, 0.0004427343  ;;  %v1439_v57 = vmax.f32 %v3631_v26, 0.0 }
 0x2d0   :  { %2192 = vpow2.f32 %v1468_v22  ;;  %v1451_v38 = vand.u32 2147483647, %v3647_v43  ;;  %v3651_v42 = vsub.f32 %v3618_v52, %v1417_v36  ;;  %v1476_v45 = vadd.f32 1.0, %v2183_v8 }
 0x2d1   :  { %v1479_v1 = vmul.f32 -0.5, %v2183_v8  ;;  %v1490_v30 = vmul.f32 %v2181_v63, %v1489_v5  ;;  %v1482_v24 = vand.u32 2147483647, %v2183_v8 }
 0x2d2   :  { %v1459_v47 = vsub.f32 0.0, %v1451_v38  ;;  %v1450_v19 = vand.u32 2147483647, %v3651_v42  ;;  %2194 = vlog2.f32 %v1476_v45 }
 0x2d3   :  { %v2185_v60 = vpop.eup %2184  ;;  %v1480_v53 = vadd.f32 1.0, %v1479_v1  ;;  %vm1483_vm2 = vcmp.lt.f32.partialorder %v1482_v24, 0.0004427343 }
 0x2d4   :  { %v1474_v62 = vmul.f32 1.442695, %v1459_v47  ;;  %v1458_v0 = vsub.f32 0.0, %v1450_v19  ;;  %v1503_v4 = vadd.f32 1.0, %v2185_v60  ;;  %v1506_v9 = vmul.f32 -0.5, %v2185_v60 }
 0x2d5   :  { %v1481_v39 = vmul.f32 %v2183_v8, %v1480_v53  ;;  %v1509_v58 = vand.u32 2147483647, %v2185_v60 }
 0x2d6   :  { %2196 = vpow2.f32 %v1474_v62  ;;  %v1472_v16 = vmul.f32 1.442695, %v1458_v0  ;;  %v1507_v34 = vadd.f32 1.0, %v1506_v9 }
 0x2d7   :  { %v2187_v18 = vpop.eup %2186  ;;  %2198 = vlog2.f32 %v1503_v4  ;;  %vm1510_vm3 = vcmp.lt.f32.partialorder %v1509_v58, 0.0004427343  ;;  %v1438_v4 = vmax.f32 %v3635_v13, 0.0 }
 0x2d8   :  { %2200 = vpow2.f32 %v1472_v16  ;;  %v1494_v35 = vadd.f32 1.0, %v2187_v18  ;;  %v1497_v61 = vmul.f32 -0.5, %v2187_v18  ;;  %v1508_v22 = vmul.f32 %v2185_v60, %v1507_v34 }
 0x2d9   :  { %v1500_v8 = vand.u32 2147483647, %v2187_v18 }
 0x2da   :  { %2202 = vlog2.f32 %v1494_v35  ;;  %v1498_v17 = vadd.f32 1.0, %v1497_v61 }
 0x2db   :  { %v3654_v23 = vpop.eup %2188  ;;  %vm1501_vm4 = vcmp.lt.f32.partialorder %v1500_v8, 0.0004427343 }
 0x2dc   :  { %v2191_v46 = vpop.eup %2190  ;;  %v1521_v54 = vadd.f32 1.0, %v3654_v23  ;;  %v1524_v63 = vmul.f32 -0.5, %v3654_v23  ;;  %v1499_v47 = vmul.f32 %v2187_v18, %v1498_v17  ;;  %v1527_v26 = vand.u32 2147483647, %v3654_v23 }
 0x2dd   :  { %v3658_v56 = vpop.eup %2192  ;;  %v1487_v27 = vmul.f32 0.6931472, %v2191_v46  ;;  %v1441_v46 = vmax.f32 %v3639_v49, 0.0 }
 0x2de   :  { %2204 = vlog2.f32 %v1521_v54  ;;  %v1512_v11 = vadd.f32 1.0, %v3658_v56  ;;  %v1515_v51 = vmul.f32 -0.5, %v3658_v56  ;;  %v1525_v0 = vadd.f32 1.0, %v1524_v63 }
 0x2df   :  { %v1493_v59 = vsel %vm1492_vm1, %v1490_v30, %v1487_v27  ;;  %v2195_v40 = vpop.eup %2194  ;;  %v1518_v35 = vand.u32 2147483647, %v3658_v56  ;;  %vm1528_vm5 = vcmp.lt.f32.partialorder %v1527_v26, 0.0004427343  ;;  %v1440_v30 = vmax.f32 %v3643_v29, 0.0 }
 0x2e0   :  { %v1549_v44 = vadd.f32 %v1493_v59, %v1437_v50  ;;  %2206 = vlog2.f32 %v1512_v11  ;;  %v1478_v32 = vmul.f32 0.6931472, %v2195_v40  ;;  %v1516_v6 = vadd.f32 1.0, %v1515_v51 }
 0x2e1   :  { %v1526_v18 = vmul.f32 %v3654_v23, %v1525_v0  ;;  %vm1519_vm6 = vcmp.lt.f32.partialorder %v1518_v35, 0.0004427343 }
 0x2e2   :  { %1566 = vrot.lane.b32.xlu1 %v1549_v44, %s2214_s4  ;;  %v1484_v15 = vsel %vm1483_vm2, %v1481_v39, %v1478_v32  ;;  %v1517_v54 = vmul.f32 %v3658_v56, %v1516_v6  ;;  %v1443_v56 = vmax.f32 %v3647_v43, 0.0 }
 0x2e3   :  { %v2197_v10 = vpop.eup %2196  ;;  %v1548_v12 = vadd.f32 %v1484_v15, %v1436_v55  ;;  %v1442_v55 = vmax.f32 %v3651_v42, 0.0 }
 0x2e4   :  { %v2199_v31 = vpop.eup %2198  ;;  %v1539_v3 = vadd.f32 1.0, %v2197_v10  ;;  %v1542_v1 = vmul.f32 -0.5, %v2197_v10  ;;  %v1545_v11 = vand.u32 2147483647, %v2197_v10 }
 0x2e5   :  { %v2201_v14 = vpop.eup %2200  ;;  %v1505_v20 = vmul.f32 0.6931472, %v2199_v31  ;;  %1564 = vrot.lane.b32.xlu0 %v1548_v12, %s2214_s4 }
 0x2e6   :  { %2208 = vlog2.f32 %v1539_v3  ;;  %v1530_v36 = vadd.f32 1.0, %v2201_v14  ;;  %v1533_v27 = vmul.f32 -0.5, %v2201_v14  ;;  %v1543_v24 = vadd.f32 1.0, %v1542_v1 }
 0x2e7   :  { %v2203_v38 = vpop.eup %2202  ;;  %v1511_v45 = vsel %vm1510_vm3, %v1508_v22, %v1505_v20  ;;  %v1536_v61 = vand.u32 2147483647, %v2201_v14  ;;  %vm1546_vm7 = vcmp.lt.f32.partialorder %v1545_v11, 0.0004427343 }
 0x2e8   :  { %v1551_v19 = vadd.f32 %v1511_v45, %v1439_v57  ;;  %v1496_v62 = vmul.f32 0.6931472, %v2203_v38  ;;  %2210 = vlog2.f32 %v1530_v36  ;;  %v1534_v59 = vadd.f32 1.0, %v1533_v27 }
 0x2e9   :  { %v1544_v44 = vmul.f32 %v2197_v10, %v1543_v24  ;;  %vm1537_vm8 = vcmp.lt.f32.partialorder %v1536_v61, 0.0004427343 }
 0x2ea   :  { %1570 = vrot.lane.b32.xlu1 %v1551_v19, %s2214_s4  ;;  %v1502_v60 = vsel %vm1501_vm4, %v1499_v47, %v1496_v62  ;;  %v1535_v34 = vmul.f32 %v2201_v14, %v1534_v59 }
 0x2eb   :  { %v2205_v16 = vpop.eup %2204  ;;  %v1550_v7 = vadd.f32 %v1502_v60, %v1438_v4 }
 0x2ec   :  { %v1523_v5 = vmul.f32 0.6931472, %v2205_v16 }
 0x2ed   :  { %v2207_v25 = vpop.eup %2206  ;;  %1568 = vrot.lane.b32.xlu0 %v1550_v7, %s2214_s4 }
 0x2ee   :  { %v1529_v13 = vsel %vm1528_vm5, %v1526_v18, %v1523_v5  ;;  %v1514_v50 = vmul.f32 0.6931472, %v2207_v25 }
 0x2ef   :  { %v1553_v53 = vadd.f32 %v1529_v13, %v1441_v46 }
 0x2f0   :  { %v1520_v9 = vsel %vm1519_vm6, %v1517_v54, %v1514_v50 }
 0x2f1   :  { %1574 = vrot.lane.b32.xlu1 %v1553_v53, %s2214_s4  ;;  %v1552_v23 = vadd.f32 %v1520_v9, %v1440_v30 }
 0x2f3   :  { %v2209_v49 = vpop.eup %2208  ;;  %1572 = vrot.lane.b32.xlu0 %v1552_v23, %s2214_s4 }
 0x2f4   :  { %v1541_v40 = vmul.f32 0.6931472, %v2209_v49 }
 0x2f5   :  { %v2211_v32 = vpop.eup %2210 }
 0x2f6   :  { %v1547_v29 = vsel %vm1546_vm7, %v1544_v44, %v1541_v40  ;;  %v1532_v39 = vmul.f32 0.6931472, %v2211_v32 }
 0x2f7   :  { %v1555_v58 = vadd.f32 %v1547_v29, %v1443_v56 }
 0x2f8   :  { %v1538_v15 = vsel %vm1537_vm8, %v1535_v34, %v1532_v39 }
 0x2f9   :  { %1578 = vrot.lane.b32.xlu1 %v1555_v58, %s2214_s4  ;;  %v1554_v17 = vadd.f32 %v1538_v15, %v1442_v55 }
 0x2fb   :  { %1576 = vrot.lane.b32.xlu0 %v1554_v17, %s2214_s4 }
 0x354   :  { %v1567_v31 = vpop.permute.xlu1 %1566 }
 0x355   :  { %v1589_v10 = vadd.f32 %v1567_v31, %v3598_v33 }
 0x357   :  { %1603 = vperm.xlu1 %2178, %v1589_v10   ;;  %v1565_v12 = vpop.permute.xlu0 %1564 }
 0x358   :  { %v1588_v43 = vadd.f32 %v1565_v12, %v3601_v41 }
 0x35a   :  { %1598 = vperm.xlu0 %2179, %v1588_v43  }
 0x35c   :  { %v1571_v63 = vpop.permute.xlu1 %1570 }
 0x35d   :  { %v1591_v3 = vadd.f32 %v1571_v63, %v3604_v28 }
 0x35f   :  { %1613 = vperm.xlu0 %2179, %v1591_v3   ;;  %v1569_v42 = vpop.permute.xlu0 %1568 }
 0x360   :  { %v1590_v14 = vadd.f32 %v1569_v42, %v3607_v2 }
 0x362   :  { %1608 = vperm.xlu1 %2178, %v1590_v14  }
 0x363   :  { %v1575_v57 = vpop.permute.xlu1 %1574 }
 0x364   :  { %v1593_v20 = vadd.f32 %v1575_v57, %v3610_v21 }
 0x365   :  { %v1573_v22 = vpop.permute.xlu0 %1572 }
 0x366   :  { %v1592_v8 = vadd.f32 %v1573_v22, %v3612_v37  ;;  %1623 = vperm.xlu0 %2179, %v1593_v20  }
 0x368   :  { %1618 = vperm.xlu1 %2178, %v1592_v8  }
 0x36b   :  { %v1579_v51 = vpop.permute.xlu1 %1578 }
 0x36c   :  { %v1595_v36 = vadd.f32 %v1579_v51, %v3616_v48 }
 0x36d   :  { %v1577_v38 = vpop.permute.xlu0 %1576 }
 0x36e   :  { %v1594_v45 = vadd.f32 %v1577_v38, %v3618_v52  ;;  %1633 = vperm.xlu0 %2179, %v1595_v36  }
 0x370   :  { %1628 = vperm.xlu1 %2178, %v1594_v45  }
 0x3d2   :  { %v1604_v47 = vpop.permute.xlu1 %1603 }
 0x3d3   :  { %v1637_v19 = vsub.f32 %v3598_v33, %v1604_v47 }
 0x3d5   :  { %1646 = vst.msk [vmem:[%s3735_s5 + $0x8] sm:$0xff] %vm1644_vm9, %v1637_v19  ;;  %v1599_v62 = vpop.permute.xlu0 %1598 }
 0x3d6   :  { %v1636_v0 = vsub.f32 %v3601_v41, %v1599_v62 }
 0x3d8   :  { %1645 = vst.msk [vmem:[%s3735_s5] sm:$0xff] %vm1644_vm9, %v1636_v0 }
 0x3da   :  { %v1614_v4 = vpop.permute.xlu0 %1613 }
 0x3db   :  { %v1639_v26 = vsub.f32 %v3604_v28, %v1614_v4 }
 0x3dd   :  { %1648 = vst.msk [vmem:[%s3735_s5 + $0x18] sm:$0xff] %vm1644_vm9, %v1639_v26  ;;  %v1609_v33 = vpop.permute.xlu1 %1608 }
 0x3de   :  { %v1638_v60 = vsub.f32 %v3607_v2, %v1609_v33 }
 0x3e0   :  { %1647 = vst.msk [vmem:[%s3735_s5 + $0x10] sm:$0xff] %vm1644_vm9, %v1638_v60 }
 0x3e1   :  { %v1624_v41 = vpop.permute.xlu0 %1623 }
 0x3e2   :  { %v1641_v6 = vsub.f32 %v3610_v21, %v1624_v41 }
 0x3e3   :  { %v1619_v16 = vpop.permute.xlu1 %1618 }
 0x3e4   :  { %1650 = vst.msk [vmem:[%s3735_s5 + $0x28] sm:$0xff] %vm1644_vm9, %v1641_v6  ;;  %v1640_v28 = vsub.f32 %v3612_v37, %v1619_v16 }
 0x3e6   :  { %1649 = vst.msk [vmem:[%s3735_s5 + $0x20] sm:$0xff] %vm1644_vm9, %v1640_v28 }
 0x3e9   :  { %v1634_v2 = vpop.permute.xlu0 %1633 }
 0x3ea   :  { %v1643_v7 = vsub.f32 %v3616_v48, %v1634_v2 }
 0x3eb   :  { %v1629_v35 = vpop.permute.xlu1 %1628 }
 0x3ec   :  { %1652 = vst.msk [vmem:[%s3735_s5 + $0x38] sm:$0xff] %vm1644_vm9, %v1643_v7  ;;  %v1642_v21 = vsub.f32 %v3618_v52, %v1629_v35 }
 0x3ee   :  { %1651 = vst.msk [vmem:[%s3735_s5 + $0x30] sm:$0xff] %vm1644_vm9, %v1642_v21 }

</bundles_post_ra>
